<compile_context>
chip_gen: v5e
topology: v5e:2x2
jax: 0.10.0
libtpu: 0.0.40
codegen_flags: <defaults>
</compile_context>

<pallas_src>
import functools
import math

import jax
import jax.numpy as jnp
import numpy as np
from jax import lax
from jax.experimental import pallas as pl
from jax.experimental.pallas import tpu as pltpu

INV_SQRT2 = 1.0 / math.sqrt(2.0)
LANE = 128


def _round_up(x, m):
    return ((x + m - 1) // m) * m


# ----------------------- shared math (kernel + reference) --------------------
def _mm(a16, b16):
    # bf16 operands -> native MXU path, f32 accumulation.
    return jnp.dot(a16, b16, preferred_element_type=jnp.float32)


def _input_proj(x016, w_in16, b_in):
    # input_projection (Conv1d k=1) + ReLU (the extra F.relu is idempotent).
    return jnp.maximum(_mm(x016, w_in16) + b_in, 0.0)                 # [T, Cp] f32


def _apply_gate(x, skip, z, w_out16, b_out, cp):
    """Gated activation + out projection + residual/skip update. Lane-aligned slices."""
    gate, filt = z[:, :cp], z[:, cp:]
    a = jax.nn.sigmoid(gate) * jnp.tanh(filt)                          # [T, Cp] f32
    o = _mm(a.astype(jnp.bfloat16), w_out16) + b_out                   # [T, 2Cp] f32
    x_new = (x + o[:, :cp]) * INV_SQRT2
    skip_new = skip + o[:, cp:]
    return x_new, skip_new


def _output_head(skip, w_skip16, b_skip, w_op16, b_op, n_layers):
    s = skip * (1.0 / math.sqrt(n_layers))                             # sum(skip)/sqrt(L)
    s = jnp.maximum(_mm(s.astype(jnp.bfloat16), w_skip16) + b_skip, 0.0)
    return _mm(s.astype(jnp.bfloat16), w_op16) + b_op                  # lane-dense [T, Mp]


def _mish(x):
    sp = jnp.where(x > 20.0, x, jnp.log1p(jnp.exp(jnp.minimum(x, 20.0))))
    return x * jnp.tanh(sp)


# ---------------------------------- kernel -----------------------------------
def _denoiser_kernel(x0_ref, cond_ref, diff_ref,
                     w_in_ref, b_in_ref, w_fused_ref, b_fused_ref,
                     w_out_ref, b_out_ref, w_skip_ref, b_skip_ref,
                     w_op_ref, b_op_ref, out_ref, ycat_ref, *, n_layers):
    T, cp = cond_ref.shape
    bf16 = jnp.bfloat16

    x = _input_proj(x0_ref[...], w_in_ref[...], b_in_ref[...])        # [T, Cp] f32
    skip0 = jnp.zeros((T, cp), jnp.float32)

    # Conditioner slab is loop-invariant: arrives in bf16 and is written into the fused
    # operand scratch exactly once (never re-cast / re-copied inside the layer loop).
    ycat_ref[:, 3 * cp:] = cond_ref[...]
    zrow = jnp.zeros((1, cp), jnp.float32)                             # hoisted

    def body(l, carry):
        x, skip = carry
        # Per-layer weights sliced out of the stacked bf16 refs -> bounded liveness.
        y = x + diff_ref[l]                                            # step conditioning [1,Cp]
        # Assemble [T, 4Cp] fused operand in the bf16 scratch via lane-aligned slab stores:
        #   [ y[t-1] | y[t] | y[t+1] | cond[t] ]  so conv(y)[t] + cond_proj(cond)[t] = ycat@Wf.
        ycat_ref[:, cp:2 * cp] = y.astype(bf16)
        ycat_ref[:, :cp] = jnp.concatenate([zrow, y[:-1]], axis=0).astype(bf16)
        ycat_ref[:, 2 * cp:3 * cp] = jnp.concatenate([y[1:], zrow], axis=0).astype(bf16)
        z = _mm(ycat_ref[...], w_fused_ref[l]) + b_fused_ref[l]        # [T, 2Cp] f32
        return _apply_gate(x, skip, z, w_out_ref[l], b_out_ref[l], cp)

    _, skip = lax.fori_loop(0, n_layers, body, (x, skip0))

    out_ref[...] = _output_head(skip, w_skip_ref[...], b_skip_ref[...],
                                w_op_ref[...], b_op_ref[...], n_layers)


# ----------------------------- wrapper-side prep ------------------------------
def diffusion_embedding(steps, dim):
    half = dim // 2
    scale = math.log(10000.0) / (half - 1)
    freqs = jnp.exp(-scale * jnp.arange(half, dtype=jnp.float32))
    ang = steps.astype(jnp.float32)[:, None] * freqs[None, :]
    return jnp.concatenate([jnp.sin(ang), jnp.cos(ang)], axis=-1)      # [B, dim]


def _compute_diff(params, diffusion_step, c_pad):
    """Diffusion-step conditioning, hoisted out of the kernel:
    sinusoidal embedding -> MLP (Linear/Mish/Linear) -> per-layer Linear(C->C).
    Returns [B, L, 1, Cp] (channel-padded)."""
    C = params['w_in'].shape[1]
    L = params['w_diff'].shape[0]
    B = diffusion_step.shape[0]
    emb = diffusion_embedding(diffusion_step, C)                       # [B, C]
    h = _mish(emb @ params['w_m1'] + params['b_m1'])                   # [B, 4C]
    d = h @ params['w_m2'] + params['b_m2']                            # [B, C]
    diff = (jnp.einsum('bc,lcd->bld', d, params['w_diff'])
            + params['b_diff'][None, :, 0, :])                         # [B, L, C]
    out = jnp.zeros((B, L, c_pad), jnp.float32).at[:, :, :C].set(diff)
    return out[:, :, None, :]                                          # [B, L, 1, Cp]


def _prepare_weights(params, c_pad, m_pad):
    """Fuse the per-layer (conv k=3 taps + cond) weights into one [4Cp,2Cp] operand,
    pad every channel/mel dim to a 128-lane multiple (gate/filt each get a whole slab),
    cast matmul weights to bf16 (biases stay f32)."""
    C = params['w_in'].shape[1]
    L = params['w_conv'].shape[0]

    def pad2(w, r, c):
        return jnp.zeros((r, c), jnp.float32).at[:w.shape[0], :w.shape[1]].set(w)

    def repack_cols(w):
        # [..., 2C] -> [..., 2Cp]: gate cols -> [0:C], filter cols -> [Cp:Cp+C]
        out = jnp.zeros(w.shape[:-1] + (2 * c_pad,), jnp.float32)
        out = out.at[..., :C].set(w[..., :C])
        out = out.at[..., c_pad:c_pad + C].set(w[..., C:])
        return out

    # Fused operand weight rows follow the scratch layout [y_prev | y | y_next | cond].
    taps = [params['w_conv'][:, 0], params['w_conv'][:, 1],
            params['w_conv'][:, 2], params['w_cond']]                  # each [L, C, 2C]
    w_fused = jnp.zeros((L, 4 * c_pad, 2 * c_pad), jnp.float32)
    for i, tap in enumerate(taps):
        w_fused = w_fused.at[:, i * c_pad:i * c_pad + C, :].set(repack_cols(tap))
    b_fused = repack_cols(params['b_conv'] + params['b_cond'])         # [L, 1, 2Cp]

    w_out = jnp.zeros((L, c_pad, 2 * c_pad), jnp.float32).at[:, :C, :].set(
        repack_cols(params['w_out']))
    b_out = repack_cols(params['b_out'])

    w_in = pad2(params['w_in'], m_pad, c_pad)
    b_in = pad2(params['b_in'], 1, c_pad)
    w_skip = pad2(params['w_skip'], c_pad, c_pad)
    b_skip = pad2(params['b_skip'], 1, c_pad)
    w_op = pad2(params['w_op'], c_pad, m_pad)
    b_op = pad2(params['b_op'], 1, m_pad)

    bf = lambda w: w.astype(jnp.bfloat16)
    return (bf(w_in), b_in, bf(w_fused), b_fused, bf(w_out), b_out,
            bf(w_skip), b_skip, bf(w_op), b_op)


def _pad_activations(params, source, conditioner, c_pad, m_pad):
    C = params['w_in'].shape[1]
    B, _, M, T = source.shape
    x0 = jnp.zeros((B, T, m_pad), jnp.float32).at[:, :, :M].set(
        jnp.transpose(source[:, 0].astype(jnp.float32), (0, 2, 1)))
    cond = jnp.zeros((B, T, c_pad), jnp.float32).at[:, :, :C].set(
        jnp.transpose(conditioner.astype(jnp.float32), (0, 2, 1)))
    # matmul inputs travel as bf16 (half the HBM->VMEM DMA; they feed bf16 matmuls anyway)
    return x0.astype(jnp.bfloat16), cond.astype(jnp.bfloat16)


def denoiser_forward(params, source, diffusion_step, conditioner):
    """source: [B,1,M,T], diffusion_step: [B], conditioner: [B,C,T] -> [B,M,T]."""
    B, _, M, T = source.shape
    C = params['w_in'].shape[1]
    L = params['w_diff'].shape[0]
    Cp = _round_up(C, LANE)                                            # lane-dense channels
    Mp = _round_up(max(M, 1), LANE)                                    # lane-dense mel slab

    x0, cond = _pad_activations(params, source, conditioner, Cp, Mp)   # [B,T,Mp]/[B,T,Cp] bf16
    diff = _compute_diff(params, diffusion_step, Cp)                   # [B, L, 1, Cp] f32
    weights = _prepare_weights(params, Cp, Mp)
    inputs = (x0, cond, diff) + weights

    def batched_spec(shape):
        nd = len(shape)
        return pl.BlockSpec((None,) + shape, lambda b, _nd=nd: (b,) + (0,) * _nd)

    def shared_spec(shape):
        nd = len(shape)
        return pl.BlockSpec(shape, lambda b, _nd=nd: (0,) * _nd)

    in_specs = ([batched_spec((T, Mp)), batched_spec((T, Cp)), batched_spec((L, 1, Cp))]
                + [shared_spec(w.shape) for w in weights])

    # VMEM budget: weights + per-batch blocks (double-buffered) + fused-operand scratch.
    nbytes = lambda a: int(np.prod(a.shape)) * a.dtype.itemsize
    weight_bytes = sum(nbytes(w) for w in weights)
    block_bytes = (nbytes(x0) + nbytes(cond) + nbytes(diff)) // B + T * Mp * 4
    scratch_bytes = T * 4 * Cp * 2
    vmem_limit = int(min(2 * weight_bytes + 2 * block_bytes + scratch_bytes + (16 << 20),
                         100 << 20))

    flops = int(2 * B * T * (Mp * Cp + L * (4 * Cp * 2 * Cp + Cp * 2 * Cp)
                             + Cp * Cp + Cp * Mp))
    transcendentals = int(2 * B * T * Cp * L)                          # sigmoid + tanh per layer
    bytes_accessed = int(sum(nbytes(a) for a in inputs) + B * T * Mp * 4)

    out = pl.pallas_call(
        functools.partial(_denoiser_kernel, n_layers=L),
        out_shape=jax.ShapeDtypeStruct((B, T, Mp), jnp.float32),
        grid=(B,),
        in_specs=in_specs,
        out_specs=batched_spec((T, Mp)),
        scratch_shapes=[pltpu.VMEM((T, 4 * Cp), jnp.bfloat16)],        # fused-operand slab
        compiler_params=pltpu.CompilerParams(
            dimension_semantics=("parallel",),
            vmem_limit_bytes=vmem_limit),
        cost_estimate=pl.CostEstimate(flops=flops, transcendentals=transcendentals,
                                      bytes_accessed=bytes_accessed),
    )(*inputs)

    return jnp.transpose(out[:, :, :M], (0, 2, 1))                     # [B, M, T]


# ----------------------------- pure-JAX reference -----------------------------
def reference_forward(params, source, diffusion_step, conditioner):
    B, _, M, T = source.shape
    C = params['w_in'].shape[1]
    L = params['w_diff'].shape[0]
    Cp = _round_up(C, LANE)
    Mp = _round_up(max(M, 1), LANE)

    x0, cond = _pad_activations(params, source, conditioner, Cp, Mp)
    diff = _compute_diff(params, diffusion_step, Cp)
    (w_in, b_in, w_fused, b_fused, w_out, b_out,
     w_skip, b_skip, w_op, b_op) = _prepare_weights(params, Cp, Mp)

    bf16 = jnp.bfloat16
    zrow = jnp.zeros((1, Cp), jnp.float32)

    def one(x0_b, cond_b, diff_b):
        x = _input_proj(x0_b, w_in, b_in)
        skip0 = jnp.zeros((T, Cp), jnp.float32)

        def body(l, carry):
            x, skip = carry
            y = x + diff_b[l]
            ycat = jnp.concatenate(
                [jnp.concatenate([zrow, y[:-1]], 0).astype(bf16),
                 y.astype(bf16),
                 jnp.concatenate([y[1:], zrow], 0).astype(bf16),
                 cond_b], axis=-1)                                     # [T, 4Cp] bf16
            z = _mm(ycat, w_fused[l]) + b_fused[l]
            return _apply_gate(x, skip, z, w_out[l], b_out[l], Cp)

        _, skip = lax.fori_loop(0, L, body, (x, skip0))
        return _output_head(skip, w_skip, b_skip, w_op, b_op, L)

    out = jax.vmap(one)(x0, cond, diff)                                # [B, T, Mp]
    return jnp.transpose(out[:, :, :M], (0, 2, 1))


# --------------------------------- parameters ---------------------------------
def init_params(key, M, C, L):
    ks = iter(jax.random.split(key, 24))

    def w(shape, fan_in):
        return jax.random.normal(next(ks), shape, jnp.float32) / math.sqrt(fan_in)

    def b(shape):
        return 0.02 * jax.random.normal(next(ks), shape, jnp.float32)

    return {
        'w_in': w((M, C), M), 'b_in': b((1, C)),
        'w_m1': w((C, 4 * C), C), 'b_m1': b((1, 4 * C)),
        'w_m2': w((4 * C, C), 4 * C), 'b_m2': b((1, C)),
        'w_diff': w((L, C, C), C), 'b_diff': b((L, 1, C)),
        'w_cond': w((L, C, 2 * C), C), 'b_cond': b((L, 1, 2 * C)),
        'w_conv': w((L, 3, C, 2 * C), 3 * C), 'b_conv': b((L, 1, 2 * C)),
        'w_out': w((L, C, 2 * C), C), 'b_out': b((L, 1, 2 * C)),
        'w_skip': w((C, C), C), 'b_skip': b((1, C)),
        # nn.init.zeros_(self.output_projection.conv.weight)
        'w_op': jnp.zeros((C, M), jnp.float32), 'b_op': b((1, M)),
    }


# ------------------------------------ main ------------------------------------
if __name__ == "__main__":
    B, M, C, L, T = 2, 16, 32, 4, 16   # batch, mel bins, residual_channels, layers, frames
    key = jax.random.PRNGKey(0)
    k_param, k_src, k_cond, k_step, k_dbg = jax.random.split(key, 5)

    params = init_params(k_param, M, C, L)
    source = jax.random.normal(k_src, (B, 1, M, T), jnp.float32)        # [B, 1, M, T]
    conditioner = jax.random.normal(k_cond, (B, C, T), jnp.float32)     # [B, C(=d_encoder), T]
    diffusion_step = jax.random.randint(k_step, (B,), 0, 1000)           # [B]

    out = denoiser_forward(params, source, diffusion_step, conditioner)
    jax.block_until_ready(out)
    assert out.shape == (B, M, T), out.shape

    # Validate the Pallas compute path against a pure-JAX reference (same bf16/f32
    # numerics).  The faithful init zeroes the output-projection weight, so also check
    # with a non-zero w_op to exercise the full residual stack numerically.
    dbg_params = dict(params)
    dbg_params['w_op'] = jax.random.normal(k_dbg, (C, M), jnp.float32) / math.sqrt(C)
    for p in (params, dbg_params):
        got = denoiser_forward(p, source, diffusion_step, conditioner)
        want = reference_forward(p, source, diffusion_step, conditioner)
        np.testing.assert_allclose(np.asarray(got), np.asarray(want), rtol=2e-3, atol=2e-3)

    print("KERNEL_OK")
</pallas_src>

<mosaic_0001>
module attributes {stable_mosaic.version = 11 : i64} {
  func.func @_denoiser_kernel(%arg0: i32, %arg1: memref<1x16x128xbf16, #tpu.memory_space<vmem>>, %arg2: memref<1x16x128xbf16, #tpu.memory_space<vmem>>, %arg3: memref<1x4x1x128xf32, #tpu.memory_space<vmem>>, %arg4: memref<128x128xbf16, #tpu.memory_space<vmem>>, %arg5: memref<1x128xf32, #tpu.memory_space<vmem>>, %arg6: memref<4x512x256xbf16, #tpu.memory_space<vmem>>, %arg7: memref<4x1x256xf32, #tpu.memory_space<vmem>>, %arg8: memref<4x128x256xbf16, #tpu.memory_space<vmem>>, %arg9: memref<4x1x256xf32, #tpu.memory_space<vmem>>, %arg10: memref<128x128xbf16, #tpu.memory_space<vmem>>, %arg11: memref<1x128xf32, #tpu.memory_space<vmem>>, %arg12: memref<128x128xbf16, #tpu.memory_space<vmem>>, %arg13: memref<1x128xf32, #tpu.memory_space<vmem>>, %arg14: memref<1x16x128xf32, #tpu.memory_space<vmem>>, %arg15: memref<16x512xbf16, #tpu.memory_space<vmem>>) attributes {dimension_semantics = [#tpu.dimension_semantics<parallel>], iteration_bounds = array<i64: 2>, scalar_prefetch = 0 : i64, scratch_operands = 1 : i64, tpu.core_type = #tpu.core_type<tc>, window_params = [{transform_indices = @transform_0, window_bounds = array<i64: 1, 16, 128>}, {transform_indices = @transform_1, window_bounds = array<i64: 1, 16, 128>}, {transform_indices = @transform_2, window_bounds = array<i64: 1, 4, 1, 128>}, {pipeline_mode = #tpu.pipeline_mode<synchronous>, transform_indices = @transform_3, window_bounds = array<i64: 128, 128>}, {pipeline_mode = #tpu.pipeline_mode<synchronous>, transform_indices = @transform_4, window_bounds = array<i64: 1, 128>}, {pipeline_mode = #tpu.pipeline_mode<synchronous>, transform_indices = @transform_5, window_bounds = array<i64: 4, 512, 256>}, {pipeline_mode = #tpu.pipeline_mode<synchronous>, transform_indices = @transform_6, window_bounds = array<i64: 4, 1, 256>}, {pipeline_mode = #tpu.pipeline_mode<synchronous>, transform_indices = @transform_7, window_bounds = array<i64: 4, 128, 256>}, {pipeline_mode = #tpu.pipeline_mode<synchronous>, transform_indices = @transform_8, window_bounds = array<i64: 4, 1, 256>}, {pipeline_mode = #tpu.pipeline_mode<synchronous>, transform_indices = @transform_9, window_bounds = array<i64: 128, 128>}, {pipeline_mode = #tpu.pipeline_mode<synchronous>, transform_indices = @transform_10, window_bounds = array<i64: 1, 128>}, {pipeline_mode = #tpu.pipeline_mode<synchronous>, transform_indices = @transform_11, window_bounds = array<i64: 128, 128>}, {pipeline_mode = #tpu.pipeline_mode<synchronous>, transform_indices = @transform_12, window_bounds = array<i64: 1, 128>}, {transform_indices = @transform_13, window_bounds = array<i64: 1, 16, 128>}]} {
    %c0 = arith.constant 0 : index
    %c0_0 = arith.constant 0 : index
    %c0_1 = arith.constant 0 : index
    %0 = vector.load %arg1[%c0, %c0_0, %c0_1] : memref<1x16x128xbf16, #tpu.memory_space<vmem>>, vector<1x16x128xbf16>
    %1 = vector.shape_cast %0 : vector<1x16x128xbf16> to vector<16x128xbf16>
    %c0_2 = arith.constant 0 : index
    %c0_3 = arith.constant 0 : index
    %2 = vector.load %arg4[%c0_2, %c0_3] : memref<128x128xbf16, #tpu.memory_space<vmem>>, vector<128x128xbf16>
    %c0_4 = arith.constant 0 : index
    %c0_5 = arith.constant 0 : index
    %3 = vector.load %arg5[%c0_4, %c0_5] : memref<1x128xf32, #tpu.memory_space<vmem>>, vector<1x128xf32>
    %cst = arith.constant dense<0.000000e+00> : vector<16x128xf32>
    %4 = tpu.matmul %1, %2, %cst {dimension_numbers = #tpu.dot_dimension_numbers<[1], [0], [0], [1], [0, 0, 1, 1], [], []>} : vector<16x128xbf16>, vector<128x128xbf16>, vector<16x128xf32> -> vector<16x128xf32>
    %5 = vector.broadcast %3 : vector<1x128xf32> to vector<16x128xf32>
    %6 = arith.addf %4, %5 : vector<16x128xf32>
    %cst_6 = arith.constant 0.000000e+00 : f32
    %7 = vector.broadcast %cst_6 : f32 to vector<16x128xf32>
    %8 = arith.maximumf %6, %7 : vector<16x128xf32>
    %cst_7 = arith.constant 0.000000e+00 : f32
    %9 = vector.broadcast %cst_7 : f32 to vector<16x128xf32>
    %c0_8 = arith.constant 0 : index
    %c0_9 = arith.constant 0 : index
    %c0_10 = arith.constant 0 : index
    %10 = vector.load %arg2[%c0_8, %c0_9, %c0_10] : memref<1x16x128xbf16, #tpu.memory_space<vmem>>, vector<1x16x128xbf16>
    %11 = vector.shape_cast %10 : vector<1x16x128xbf16> to vector<16x128xbf16>
    %c0_11 = arith.constant 0 : index
    %c384 = arith.constant 384 : index
    %12 = vector.load %arg15[%c0_11, %c384] : memref<16x512xbf16, #tpu.memory_space<vmem>>, vector<16x128xbf16>
    tpu.vector_store %arg15[%c0_11, %c384], %11 {strides = array<i32>} : memref<16x512xbf16, #tpu.memory_space<vmem>>, vector<16x128xbf16>,
    %cst_12 = arith.constant 0.000000e+00 : f32
    %13 = vector.broadcast %cst_12 : f32 to vector<1x128xf32>
    %c0_i32 = arith.constant 0 : i32
    %c4_i32 = arith.constant 4 : i32
    %14 = arith.addi %c0_i32, %c4_i32 : i32
    %c1_i32 = arith.constant 1 : i32
    %15:2 = scf.for %arg16 = %c0_i32 to %14 step %c1_i32 iter_args(%arg17 = %8, %arg18 = %9) -> (vector<16x128xf32>, vector<16x128xf32>)  : i32 {
      %c0_29 = arith.constant 0 : index
      %35 = arith.index_cast %arg16 : i32 to index
      %c0_30 = arith.constant 0 : index
      %c0_31 = arith.constant 0 : index
      %36 = vector.load %arg3[%c0_29, %35, %c0_30, %c0_31] : memref<1x4x1x128xf32, #tpu.memory_space<vmem>>, vector<1x1x1x128xf32>
      %37 = vector.shape_cast %36 : vector<1x1x1x128xf32> to vector<1x128xf32>
      %38 = vector.broadcast %37 : vector<1x128xf32> to vector<16x128xf32>
      %39 = arith.addf %arg17, %38 : vector<16x128xf32>
      %40 = arith.truncf %39 : vector<16x128xf32> to vector<16x128xbf16>
      %c0_32 = arith.constant 0 : index
      %c128 = arith.constant 128 : index
      %41 = vector.load %arg15[%c0_32, %c128] : memref<16x512xbf16, #tpu.memory_space<vmem>>, vector<16x128xbf16>
      tpu.vector_store %arg15[%c0_32, %c128], %40 {strides = array<i32>} : memref<16x512xbf16, #tpu.memory_space<vmem>>, vector<16x128xbf16>,
      %42 = vector.extract_strided_slice %39 {offsets = [0, 0], sizes = [15, 128], strides = [1, 1]} : vector<16x128xf32> to vector<15x128xf32>
      %43 = tpu.concatenate %13, %42 in 0 : vector<1x128xf32>, vector<15x128xf32> -> vector<16x128xf32>
      %44 = arith.truncf %43 : vector<16x128xf32> to vector<16x128xbf16>
      %c0_33 = arith.constant 0 : index
      %c0_34 = arith.constant 0 : index
      %45 = vector.load %arg15[%c0_33, %c0_34] : memref<16x512xbf16, #tpu.memory_space<vmem>>, vector<16x128xbf16>
      tpu.vector_store %arg15[%c0_33, %c0_34], %44 {strides = array<i32>} : memref<16x512xbf16, #tpu.memory_space<vmem>>, vector<16x128xbf16>,
      %46 = vector.extract_strided_slice %39 {offsets = [1, 0], sizes = [15, 128], strides = [1, 1]} : vector<16x128xf32> to vector<15x128xf32>
      %47 = tpu.concatenate %46, %13 in 0 : vector<15x128xf32>, vector<1x128xf32> -> vector<16x128xf32>
      %48 = arith.truncf %47 : vector<16x128xf32> to vector<16x128xbf16>
      %c0_35 = arith.constant 0 : index
      %c256 = arith.constant 256 : index
      %49 = vector.load %arg15[%c0_35, %c256] : memref<16x512xbf16, #tpu.memory_space<vmem>>, vector<16x128xbf16>
      tpu.vector_store %arg15[%c0_35, %c256], %48 {strides = array<i32>} : memref<16x512xbf16, #tpu.memory_space<vmem>>, vector<16x128xbf16>,
      %c0_36 = arith.constant 0 : index
      %c0_37 = arith.constant 0 : index
      %50 = vector.load %arg15[%c0_36, %c0_37] : memref<16x512xbf16, #tpu.memory_space<vmem>>, vector<16x512xbf16>
      %51 = arith.index_cast %arg16 : i32 to index
      %c0_38 = arith.constant 0 : index
      %c0_39 = arith.constant 0 : index
      %52 = vector.load %arg6[%51, %c0_38, %c0_39] : memref<4x512x256xbf16, #tpu.memory_space<vmem>>, vector<1x512x256xbf16>
      %53 = vector.shape_cast %52 : vector<1x512x256xbf16> to vector<512x256xbf16>
      %cst_40 = arith.constant dense<0.000000e+00> : vector<16x256xf32>
      %54 = tpu.matmul %50, %53, %cst_40 {dimension_numbers = #tpu.dot_dimension_numbers<[1], [0], [0], [1], [0, 0, 1, 1], [], []>} : vector<16x512xbf16>, vector<512x256xbf16>, vector<16x256xf32> -> vector<16x256xf32>
      %55 = arith.index_cast %arg16 : i32 to index
      %c0_41 = arith.constant 0 : index
      %c0_42 = arith.constant 0 : index
      %56 = vector.load %arg7[%55, %c0_41, %c0_42] : memref<4x1x256xf32, #tpu.memory_space<vmem>>, vector<1x1x256xf32>
      %57 = vector.shape_cast %56 : vector<1x1x256xf32> to vector<1x256xf32>
      %58 = vector.broadcast %57 : vector<1x256xf32> to vector<16x256xf32>
      %59 = arith.addf %54, %58 : vector<16x256xf32>
      %60 = arith.index_cast %arg16 : i32 to index
      %c0_43 = arith.constant 0 : index
      %c0_44 = arith.constant 0 : index
      %61 = vector.load %arg8[%60, %c0_43, %c0_44] : memref<4x128x256xbf16, #tpu.memory_space<vmem>>, vector<1x128x256xbf16>
      %62 = vector.shape_cast %61 : vector<1x128x256xbf16> to vector<128x256xbf16>
      %63 = arith.index_cast %arg16 : i32 to index
      %c0_45 = arith.constant 0 : index
      %c0_46 = arith.constant 0 : index
      %64 = vector.load %arg9[%63, %c0_45, %c0_46] : memref<4x1x256xf32, #tpu.memory_space<vmem>>, vector<1x1x256xf32>
      %65 = vector.shape_cast %64 : vector<1x1x256xf32> to vector<1x256xf32>
      %66 = vector.extract_strided_slice %59 {offsets = [0, 0], sizes = [16, 128], strides = [1, 1]} : vector<16x256xf32> to vector<16x128xf32>
      %67 = vector.extract_strided_slice %59 {offsets = [0, 128], sizes = [16, 128], strides = [1, 1]} : vector<16x256xf32> to vector<16x128xf32>
      %68 = arith.negf %66 : vector<16x128xf32>
      %69 = math.exp %68 : vector<16x128xf32>
      %cst_47 = arith.constant 1.000000e+00 : f32
      %70 = vector.broadcast %cst_47 : f32 to vector<16x128xf32>
      %71 = arith.addf %70, %69 : vector<16x128xf32>
      %72 = arith.divf %70, %71 : vector<16x128xf32>
      %73 = math.tanh %67 : vector<16x128xf32>
      %74 = arith.mulf %72, %73 : vector<16x128xf32>
      %75 = arith.truncf %74 : vector<16x128xf32> to vector<16x128xbf16>
      %cst_48 = arith.constant dense<0.000000e+00> : vector<16x256xf32>
      %76 = tpu.matmul %75, %62, %cst_48 {dimension_numbers = #tpu.dot_dimension_numbers<[1], [0], [0], [1], [0, 0, 1, 1], [], []>} : vector<16x128xbf16>, vector<128x256xbf16>, vector<16x256xf32> -> vector<16x256xf32>
      %77 = vector.broadcast %65 : vector<1x256xf32> to vector<16x256xf32>
      %78 = arith.addf %76, %77 : vector<16x256xf32>
      %79 = vector.extract_strided_slice %78 {offsets = [0, 0], sizes = [16, 128], strides = [1, 1]} : vector<16x256xf32> to vector<16x128xf32>
      %80 = arith.addf %arg17, %79 : vector<16x128xf32>
      %cst_49 = arith.constant 0.707106769 : f32
      %81 = vector.broadcast %cst_49 : f32 to vector<16x128xf32>
      %82 = arith.mulf %80, %81 : vector<16x128xf32>
      %83 = vector.extract_strided_slice %78 {offsets = [0, 128], sizes = [16, 128], strides = [1, 1]} : vector<16x256xf32> to vector<16x128xf32>
      %84 = arith.addf %arg18, %83 : vector<16x128xf32>
      scf.yield %82, %84 : vector<16x128xf32>, vector<16x128xf32>
    }
    %c4_i32_13 = arith.constant 4 : i32
    %c0_14 = arith.constant 0 : index
    %c0_15 = arith.constant 0 : index
    %16 = vector.load %arg10[%c0_14, %c0_15] : memref<128x128xbf16, #tpu.memory_space<vmem>>, vector<128x128xbf16>
    %c0_16 = arith.constant 0 : index
    %c0_17 = arith.constant 0 : index
    %17 = vector.load %arg11[%c0_16, %c0_17] : memref<1x128xf32, #tpu.memory_space<vmem>>, vector<1x128xf32>
    %c0_18 = arith.constant 0 : index
    %c0_19 = arith.constant 0 : index
    %18 = vector.load %arg12[%c0_18, %c0_19] : memref<128x128xbf16, #tpu.memory_space<vmem>>, vector<128x128xbf16>
    %c0_20 = arith.constant 0 : index
    %c0_21 = arith.constant 0 : index
    %19 = vector.load %arg13[%c0_20, %c0_21] : memref<1x128xf32, #tpu.memory_space<vmem>>, vector<1x128xf32>
    %cst_22 = arith.constant 5.000000e-01 : f32
    %20 = vector.broadcast %cst_22 : f32 to vector<16x128xf32>
    %21 = arith.mulf %15#1, %20 : vector<16x128xf32>
    %22 = arith.truncf %21 : vector<16x128xf32> to vector<16x128xbf16>
    %cst_23 = arith.constant dense<0.000000e+00> : vector<16x128xf32>
    %23 = tpu.matmul %22, %16, %cst_23 {dimension_numbers = #tpu.dot_dimension_numbers<[1], [0], [0], [1], [0, 0, 1, 1], [], []>} : vector<16x128xbf16>, vector<128x128xbf16>, vector<16x128xf32> -> vector<16x128xf32>
    %24 = vector.broadcast %17 : vector<1x128xf32> to vector<16x128xf32>
    %25 = arith.addf %23, %24 : vector<16x128xf32>
    %cst_24 = arith.constant 0.000000e+00 : f32
    %26 = vector.broadcast %cst_24 : f32 to vector<16x128xf32>
    %27 = arith.maximumf %25, %26 : vector<16x128xf32>
    %28 = arith.truncf %27 : vector<16x128xf32> to vector<16x128xbf16>
    %cst_25 = arith.constant dense<0.000000e+00> : vector<16x128xf32>
    %29 = tpu.matmul %28, %18, %cst_25 {dimension_numbers = #tpu.dot_dimension_numbers<[1], [0], [0], [1], [0, 0, 1, 1], [], []>} : vector<16x128xbf16>, vector<128x128xbf16>, vector<16x128xf32> -> vector<16x128xf32>
    %30 = vector.broadcast %19 : vector<1x128xf32> to vector<16x128xf32>
    %31 = arith.addf %29, %30 : vector<16x128xf32>
    %c0_26 = arith.constant 0 : index
    %c0_27 = arith.constant 0 : index
    %c0_28 = arith.constant 0 : index
    %32 = vector.load %arg14[%c0_26, %c0_27, %c0_28] : memref<1x16x128xf32, #tpu.memory_space<vmem>>, vector<1x16x128xf32>
    %33 = vector.shape_cast %32 : vector<1x16x128xf32> to vector<16x128xf32>
    %34 = vector.shape_cast %31 : vector<16x128xf32> to vector<1x16x128xf32>
    tpu.vector_store %arg14[%c0_26, %c0_27, %c0_28], %34 {strides = array<i32>} : memref<1x16x128xf32, #tpu.memory_space<vmem>>, vector<1x16x128xf32>,
    return
  }
  func.func @transform_0(%arg0: i32) -> (i32, i32, i32) {
    %c0_i32 = arith.constant 0 : i32
    %c0_i32_0 = arith.constant 0 : i32
    %c0_i32_1 = arith.constant 0 : i32
    return %arg0, %c0_i32, %c0_i32_0 : i32, i32, i32
  }
  func.func @transform_1(%arg0: i32) -> (i32, i32, i32) {
    %c0_i32 = arith.constant 0 : i32
    %c0_i32_0 = arith.constant 0 : i32
    %c0_i32_1 = arith.constant 0 : i32
    return %arg0, %c0_i32, %c0_i32_0 : i32, i32, i32
  }
  func.func @transform_2(%arg0: i32) -> (i32, i32, i32, i32) {
    %c0_i32 = arith.constant 0 : i32
    %c0_i32_0 = arith.constant 0 : i32
    %c0_i32_1 = arith.constant 0 : i32
    %c0_i32_2 = arith.constant 0 : i32
    return %arg0, %c0_i32, %c0_i32_0, %c0_i32_1 : i32, i32, i32, i32
  }
  func.func @transform_3(%arg0: i32) -> (i32, i32) {
    %c0_i32 = arith.constant 0 : i32
    %c0_i32_0 = arith.constant 0 : i32
    %c0_i32_1 = arith.constant 0 : i32
    return %c0_i32, %c0_i32_0 : i32, i32
  }
  func.func @transform_4(%arg0: i32) -> (i32, i32) {
    %c0_i32 = arith.constant 0 : i32
    %c0_i32_0 = arith.constant 0 : i32
    %c0_i32_1 = arith.constant 0 : i32
    return %c0_i32, %c0_i32_0 : i32, i32
  }
  func.func @transform_5(%arg0: i32) -> (i32, i32, i32) {
    %c0_i32 = arith.constant 0 : i32
    %c0_i32_0 = arith.constant 0 : i32
    %c0_i32_1 = arith.constant 0 : i32
    %c0_i32_2 = arith.constant 0 : i32
    return %c0_i32, %c0_i32_0, %c0_i32_1 : i32, i32, i32
  }
  func.func @transform_6(%arg0: i32) -> (i32, i32, i32) {
    %c0_i32 = arith.constant 0 : i32
    %c0_i32_0 = arith.constant 0 : i32
    %c0_i32_1 = arith.constant 0 : i32
    %c0_i32_2 = arith.constant 0 : i32
    return %c0_i32, %c0_i32_0, %c0_i32_1 : i32, i32, i32
  }
  func.func @transform_7(%arg0: i32) -> (i32, i32, i32) {
    %c0_i32 = arith.constant 0 : i32
    %c0_i32_0 = arith.constant 0 : i32
    %c0_i32_1 = arith.constant 0 : i32
    %c0_i32_2 = arith.constant 0 : i32
    return %c0_i32, %c0_i32_0, %c0_i32_1 : i32, i32, i32
  }
  func.func @transform_8(%arg0: i32) -> (i32, i32, i32) {
    %c0_i32 = arith.constant 0 : i32
    %c0_i32_0 = arith.constant 0 : i32
    %c0_i32_1 = arith.constant 0 : i32
    %c0_i32_2 = arith.constant 0 : i32
    return %c0_i32, %c0_i32_0, %c0_i32_1 : i32, i32, i32
  }
  func.func @transform_9(%arg0: i32) -> (i32, i32) {
    %c0_i32 = arith.constant 0 : i32
    %c0_i32_0 = arith.constant 0 : i32
    %c0_i32_1 = arith.constant 0 : i32
    return %c0_i32, %c0_i32_0 : i32, i32
  }
  func.func @transform_10(%arg0: i32) -> (i32, i32) {
    %c0_i32 = arith.constant 0 : i32
    %c0_i32_0 = arith.constant 0 : i32
    %c0_i32_1 = arith.constant 0 : i32
    return %c0_i32, %c0_i32_0 : i32, i32
  }
  func.func @transform_11(%arg0: i32) -> (i32, i32) {
    %c0_i32 = arith.constant 0 : i32
    %c0_i32_0 = arith.constant 0 : i32
    %c0_i32_1 = arith.constant 0 : i32
    return %c0_i32, %c0_i32_0 : i32, i32
  }
  func.func @transform_12(%arg0: i32) -> (i32, i32) {
    %c0_i32 = arith.constant 0 : i32
    %c0_i32_0 = arith.constant 0 : i32
    %c0_i32_1 = arith.constant 0 : i32
    return %c0_i32, %c0_i32_0 : i32, i32
  }
  func.func @transform_13(%arg0: i32) -> (i32, i32, i32) {
    %c0_i32 = arith.constant 0 : i32
    %c0_i32_0 = arith.constant 0 : i32
    %c0_i32_1 = arith.constant 0 : i32
    return %arg0, %c0_i32, %c0_i32_0 : i32, i32, i32
  }
}

</mosaic_0001>

<bundles_post_ra>
// kernel: tpu_custom_call.1
= control target key start
LH: loop header
LB: loop body
LE: loop exit
PB: predicated region body
PF: predicated region fallthrough
CT: control target
= control target key end

     0   :  { %s3732_s0 = inlined_call_operand.hbm [shape: bf16[2,16,128], index: 0, kind: input, shape index: {}]   ;;  %s3733_s1 = inlined_call_operand.hbm [shape: bf16[2,16,128], index: 1, kind: input, shape index: {}]   ;;  %s3734_s2 = inlined_call_operand.hbm [shape: f32[2,4,1,128], index: 2, kind: input, shape index: {}]   ;;  %s3735_s3 = inlined_call_operand.hbm [shape: bf16[128,128], index: 3, kind: input, shape index: {}]   ;;  %s3736_s4 = inlined_call_operand.vmem [shape: f32[1,128], index: 4, kind: input, shape index: {}]   ;;  %s3737_s5 = inlined_call_operand.hbm [shape: bf16[4,512,256], index: 5, kind: input, shape index: {}]   ;;  %s3738_s6 = inlined_call_operand.hbm [shape: f32[4,1,256], index: 6, kind: input, shape index: {}]   ;;  %s3739_s7 = inlined_call_operand.hbm [shape: bf16[4,128,256], index: 7, kind: input, shape index: {}]   ;;  %s3740_s8 = inlined_call_operand.hbm [shape: f32[4,1,256], index: 8, kind: input, shape index: {}]   ;;  %s3741_s9 = inlined_call_operand.hbm [shape: bf16[128,128], index: 9, kind: input, shape index: {}]   ;;  %s3742_s10 = inlined_call_operand.vmem [shape: f32[1,128], index: 10, kind: input, shape index: {}]   ;;  %s3743_s11 = inlined_call_operand.hbm [shape: bf16[128,128], index: 11, kind: input, shape index: {}]   ;;  %s3744_s12 = inlined_call_operand.vmem [shape: f32[1,128], index: 12, kind: input, shape index: {}]   ;;  %s3745_s13 = inlined_call_operand.hbm [shape: f32[2,16,128], index: 13, kind: output, shape index: {}]  }
   0x1   :  { %3761 = sst [smem:[#allocation34_spill]] %s3733_s1 }
   0x2   :  { %3762 = sst [smem:[#allocation35_spill]] %s3735_s3 }
   0x3   :  { %3763 = sst [smem:[#allocation36_spill]] %s3738_s6 }
   0x4   :  { %3764 = sst [smem:[#allocation37_spill]] %s3740_s8 }
   0x5   :  { %3765 = sst [smem:[#allocation38_spill]] %s3742_s10 }
   0x6   :  { %3766 = sst [smem:[#allocation39_spill]] %s3744_s12 }
   0x7   :  { %3767 = sst [smem:[#allocation40_spill]] %s3745_s13 }
   0x8   :  { %18 = vsyncpa [#allocation4], 0 }
   0x9   :  { %20 = vsyncpa [#allocation4 + $0x1], 0 }
   0xa   :  { %21 = vsyncpa [#allocation7], 0 }
   0xb   :  { %23 = vsyncpa [#allocation7 + $0x1], 0 }
   0xc   :  { %24 = vsyncpa [#allocation10], 0 }
   0xd   :  { %25 = vsyncpa [#allocation13], 0 }
   0xe   :  { %26 = vsyncpa [#allocation16], 0 }
   0xf   :  { %27 = vsyncpa [#allocation19], 0 }
  0x10   :  { %28 = vsyncpa [#allocation5], 0 }
  0x11   :  { %30 = vsyncpa [#allocation5 + $0x1], 0  ;;  %s3209_s25 = smov 0   ;;  %s3211_s26 = smov 0  }
  0x12   :  { %s3213_s27 = smov 0   ;;  %s3215_s28 = smov 0  }
  0x13 LB: > { %3768 = sst [smem:[#allocation28_spill]] %s3088_s25  ;;  %s3233_s15 = sadd.s32 4294967295, %s3100_s28   ;;  %s3100_s28 = sphi %s3215_s28, %s3805_s28   ;;  %s3096_s27 = sphi %s3213_s27, %s3807_s27   ;;  %s3092_s26 = sphi %s3211_s26, %s3809_s26   ;;  %s3088_s25 = sphi %s3209_s25, %s3808_s25  }
  0x14   : > { %3769 = sst [smem:[#allocation29_spill]] %s3096_s27  ;;  %p1910_p0 = scmp.ge.s32.totalorder %s3100_s28, 1 }
  0x15   : > { %s3770_s3 = sld [smem:[#allocation35_spill]]  ;;  %p3759_p1 = scmp.eq.s32.totalorder %s3233_s15, 0 }
  0x16   : > { %p355_p2 = scmp.lt.s32.totalorder %s3100_s28, 3  ;;  %s3122_s17 = smov [#allocation9]  }
  0x17   : > { %s368_s18 = sshll.u32 %s3122_s17, 4  ;;  %s3772_s6 = sld [smem:[#allocation36_spill]]  ;;  %s369_s18 = int_to_ptr.vmem [resolvable:$true] %s368_s18 }
  0x18   : > { %p3238_p3 = pnand %p1910_p0, %p355_p2  ;;  %s3123_s23 = smov [#allocation12]  }
  0x19   : > { %s399_s24 = sshll.u32 %s3123_s23, 4  ;;  %s3747_s29 = smov 64   ;;  %s400_s24 = int_to_ptr.vmem [resolvable:$true] %s399_s24 }
  0x1a   : > { %p2537_p4 = pneg %p3238_p3  ;;  %s3749_s30 = smov 4  }
  0x1b   : > { %s366_s14 = sshll.u32 %s3770_s3, 4  ;;  %s3126_s17 = smov 32   ;;  %s367_s14 = int_to_ptr.hbm [resolvable:$true] %s366_s14 }
  0x1c   : > { %p3250_p6 = pnand %p2537_p4, %p3759_p1  ;;  %s3127_s19 = smov 2  }
  0x1d   : > { %s397_s21 = sshll.u32 %s3772_s6, 4  ;;  %s3774_s8 = sld [smem:[#allocation37_spill]]  ;;  %s398_s21 = int_to_ptr.hbm [resolvable:$true] %s397_s21 }
  0x1e   : > { %2540 = dma.hbm_to_vmem [thread:$0]  (!%p3250_p6), %s367_s14, 1024, %s369_s18, [#allocation10], %s3747_s29, %s3747_s29, %s3749_s30  }
  0x1f   : > { %2546 = dma.hbm_to_vmem [thread:$0]  (!%p3250_p6), %s398_s21, 128, %s400_s24, [#allocation13], %s3126_s17, %s3126_s17, %s3127_s19  }
  0x20   : > { %s3128_s6 = smov [#allocation15]   ;;  %s1909_s14 = sadd.s32 4294967294, %s3100_s28  }
  0x21   : > { %s427_s13 = sshll.u32 %s3128_s6, 4  ;;  %s3268_s18 = sadd.s32 1, %s3100_s28   ;;  %s428_s13 = int_to_ptr.vmem [resolvable:$true] %s427_s13 }
  0x22   : > { %3775 = sst [smem:[#allocation30_spill]] %s3268_s18  ;;  %s43_s29 = sadd.s32 1, %s3096_s27 }
  0x23   : > { %s425_s3 = sshll.u32 %s3774_s8, 4  ;;  %s40_s21 = ssub.s32 %s3100_s28, %s3268_s18  ;;  %s426_s3 = int_to_ptr.hbm [resolvable:$true] %s425_s3 }
  0x24   : > { %2552 = dma.hbm_to_vmem [thread:$0]  (!%p3250_p6), %s426_s3, 128, %s428_s13, [#allocation16], %s3126_s17, %s3126_s17, %s3127_s19  }
  0x25   : > { %p50_p7 = scmp.ne.s32.totalorder %s3096_s27, %s3092_s26  ;;  %p41_p8 = scmp.eq.s32.totalorder %s40_s21, 0 }
  0x26   : > { %p51_p9 = scmp.eq.s32.totalorder %s3100_s28, 0  ;;  %p56_p10 = scmp.ne.s32.totalorder %s3092_s26, %s3088_s25 }
  0x27   : > { %p342_p11 = scmp.eq.s32.totalorder %s3233_s15, 1  ;;  %p348_p2 = scmp.eq.s32.totalorder %s1909_s14, 1 }
  0x28   : > { %s3280_s6 = scalar_select %p41_p8, %s3096_s27, %s43_s29  }
  0x29   : > { %p52_p12 = por %p51_p9, %p50_p7  ;;  %p3284_p13 = por %p3759_p1, %p56_p10 }
  0x2a   : > { %3776 = sst [smem:[#allocation31_spill]] %s3280_s6  ;;  %p3288_p0 = por %p342_p11, %p50_p7 }
  0x2b   : > { %p2580_p4 = scmp.lt.s32.totalorder %s3100_s28, 2  ;;  %s3294_s24 = sand.u32 1, %s3096_s27  }
  0x2c   : > { %s3778_s13 = scalar_select %p3288_p0, 1, 0 }
  0x2d   : > { %p3296_p5 = por %p348_p2, %p56_p10  ;;  %s3758_s29 = sshll.u32 %s3294_s24, 3 }
  0x2e   : > { %3779 = sst [smem:[#allocation32_spill]] %s3778_s13  ;;  %s3760_s19 = sshll.u32 %s3100_s28, 3 }
  0x2f   : > { %s3780_s17 = scalar_select %p3296_p5, 1, 0 }
  0x30   : > { %p3302_p8 = pnand %p2580_p4, %p52_p12  ;;  %s497_s23 = sand.u32 1, %s3100_s28  }
  0x31   : > { %3781 = sst [smem:[#allocation33_spill]] %s3780_s17  ;;  %s501_s8 = scalar_lea.vmem [#allocation6], %s3758_s29 }
  0x32   : > { %s3783_s1 = sld [smem:[#allocation34_spill]]  ;;  %s509_s6 = sshll.u32 %s501_s8, 4  ;;  %s510_s6 = int_to_ptr.vmem [resolvable:$true] %s509_s6 }
  0x33   : > { %s383_s25 = sshll.u32 %s3737_s5, 4  ;;  %s3317_s13 = scalar_lea.sflag [#allocation7], %s497_s23  ;;  %s384_s25 = int_to_ptr.hbm [resolvable:$true] %s383_s25 }
  0x34   : > { %p2788_p9 = pneg %p3302_p8 }
  0x38   : > { %s506_s30 = scalar_lea.hbm %s3783_s1, %s3760_s19  ;;  %s2791_s14 = scalar_lea.hbm %s3783_s1, 16 }
  0x39   : > { %s507_s27 = sshll.u32 %s506_s30, 4  ;;  %s508_s27 = int_to_ptr.hbm [resolvable:$true] %s507_s27 }
  0x3a   : > { %s2784_s12 = sshra.s32 %s508_s27, 4  ;;  %s2785_s12 = int_to_ptr.hbm [resolvable:$true] %s2784_s12 }
  0x3b   : > { %s2786_s10 = scalar_lea.hbm %s2785_s12, 8  ;;  %p2792_p12 = scmp.lt.s32.totalorder %s2785_s12, %s3783_s1 }
  0x3c   : > { %p2787_p7 = scmp.ne.s32.totalorder %s2785_s12, %s2786_s10  ;;  %p2793_p2 = scmp.lt.s32.totalorder %s2791_s14, %s2786_s10 }
  0x3e   : > { %p2789_p10 = pnand %p2788_p9, %p2787_p7  ;;  %p2794_p4 = por %p2793_p2, %p2792_p12 }
  0x40   : > { %p2790_p11 = pneg %p2789_p10 }
  0x42   : > { %p2795_p1 = pnand %p2794_p4, %p2790_p11 }
  0x44   : > { %2798 = shalt.err (!%p2795_p1)
}
  0x45   : > { %s3784_s18 = smov 4   ;;  %s3785_s17 = smov 64  }
  0x46   : > { %2565 = dma.hbm_to_vmem [thread:$0]  (!%p3302_p8), %s508_s27, 128, %s510_s6, %s3317_s13, %s3785_s17, %s3785_s17, %s3784_s18  }
  0x47   : > { %s3129_s23 = smov [#allocation11]   ;;  %s3130_s30 = smov 128  }
  0x48   : > { %s385_s8 = sshll.u32 %s3129_s23, 4  ;;  %s3131_s12 = smov 8   ;;  %s386_s8 = int_to_ptr.vmem [resolvable:$true] %s385_s8 }
  0x49   : > { %2543 = dma.hbm_to_vmem [thread:$0]  (!%p3250_p6), %s384_s25, 32768, %s386_s8, [#allocation10], %s3130_s30, %s3130_s30, %s3131_s12  }
  0x4a   : > { %s411_s14 = sshll.u32 %s3739_s7, 4  ;;  %s3132_s21 = smov [#allocation14]   ;;  %s412_s14 = int_to_ptr.hbm [resolvable:$true] %s411_s14 }
  0x4b   : > { %s413_s19 = sshll.u32 %s3132_s21, 4  ;;  %s439_s23 = sshll.u32 %s3741_s9, 4  ;;  %s414_s19 = int_to_ptr.vmem [resolvable:$true] %s413_s19  ;;  %s440_s23 = int_to_ptr.hbm [resolvable:$true] %s439_s23 }
  0x4c   : > { %2549 = dma.hbm_to_vmem [thread:$0]  (!%p3250_p6), %s412_s14, 8192, %s414_s19, [#allocation13], %s3130_s30, %s3130_s30, %s3131_s12  }
  0x4d   : > { %s3133_s1 = smov [#allocation17]   ;;  %s456_s29 = sshll.u32 %s3743_s11, 4  ;;  %s457_s29 = int_to_ptr.hbm [resolvable:$true] %s456_s29 }
  0x4e   : > { %s441_s25 = sshll.u32 %s3133_s1, 4  ;;  %s3134_s21 = smov [#allocation18]   ;;  %s442_s25 = int_to_ptr.vmem [resolvable:$true] %s441_s25 }
  0x4f   : > { %2555 = dma.hbm_to_vmem [thread:$0]  (!%p3250_p6), %s440_s23, 1024, %s442_s25, [#allocation16], %s3785_s17, %s3785_s17, %s3784_s18  }
  0x50   : > { %s458_s27 = sshll.u32 %s3134_s21, 4  ;;  %s3786_s19 = sshll.u32 %s3100_s28, 3  ;;  %s459_s27 = int_to_ptr.vmem [resolvable:$true] %s458_s27 }
  0x51   : > { %s484_s1 = scalar_lea.hbm %s3732_s0, %s3786_s19  ;;  %s3787_s6 = sshll.u32 %s3294_s24, 3 }
  0x52   : > { %2558 = dma.hbm_to_vmem [thread:$0]  (!%p3250_p6), %s457_s29, 1024, %s459_s27, [#allocation19], %s3785_s17, %s3785_s17, %s3784_s18  }
  0x53   : > { %s485_s14 = sshll.u32 %s484_s1, 4  ;;  %s479_s8 = scalar_lea.vmem [#allocation3], %s3787_s6  ;;  %s486_s14 = int_to_ptr.hbm [resolvable:$true] %s485_s14 }
  0x54   : > { %s487_s10 = sshll.u32 %s479_s8, 4  ;;  %s476_s23 = scalar_lea.sflag [#allocation4], %s3294_s24  ;;  %s488_s10 = int_to_ptr.vmem [resolvable:$true] %s487_s10 }
  0x55   : > { %s2934_s25 = sshra.s32 %s486_s14, 4  ;;  %s2941_s30 = scalar_lea.hbm %s3732_s0, 16  ;;  %s2935_s25 = int_to_ptr.hbm [resolvable:$true] %s2934_s25 }
  0x56   : > { %s2936_s21 = scalar_lea.hbm %s2935_s25, 8  ;;  %p2942_p6 = scmp.lt.s32.totalorder %s2935_s25, %s3732_s0 }
  0x57   : > { %p2937_p1 = scmp.ne.s32.totalorder %s2935_s25, %s2936_s21  ;;  %p2943_p11 = scmp.lt.s32.totalorder %s2941_s30, %s2936_s21 }
  0x59   : > { %p2939_p7 = pnand %p2937_p1, %p2788_p9  ;;  %p2944_p12 = por %p2943_p11, %p2942_p6 }
  0x5b   : > { %p2940_p10 = pneg %p2939_p7 }
  0x5d   : > { %p2945_p2 = pnand %p2944_p12, %p2940_p10 }
  0x5f   : > { %2948 = shalt.err (!%p2945_p2)
}
  0x60   : > { %2562 = dma.hbm_to_vmem [thread:$0]  (!%p3302_p8), %s486_s14, 128, %s488_s10, %s476_s23, %s3785_s17, %s3785_s17, %s3784_s18  }
  0x61   : > { %s1925_s12 = sshll.u32 %s3294_s24, 2  ;;  %s1926_s1 = sshll.u32 %s3100_s28, 2 }
  0x62   : > { %s527_s22 = scalar_lea.hbm %s3734_s2, %s1926_s1  ;;  %s523_s21 = scalar_lea.vmem [#allocation8], %s1925_s12 }
  0x63   : > { %s528_s25 = sshll.u32 %s527_s22, 4  ;;  %s530_s19 = sshll.u32 %s523_s21, 4  ;;  %s529_s25 = int_to_ptr.hbm [resolvable:$true] %s528_s25  ;;  %s531_s19 = int_to_ptr.vmem [resolvable:$true] %s530_s19 }
  0x64   : > { %s2964_s30 = sshra.s32 %s529_s25, 4  ;;  %s2971_s17 = scalar_lea.hbm %s3734_s2, 8  ;;  %s2965_s30 = int_to_ptr.hbm [resolvable:$true] %s2964_s30 }
  0x65   : > { %s2966_s29 = scalar_lea.hbm %s2965_s30, 4  ;;  %p2972_p10 = scmp.lt.s32.totalorder %s2965_s30, %s3734_s2 }
  0x66   : > { %p2967_p4 = scmp.ne.s32.totalorder %s2965_s30, %s2966_s29  ;;  %p2973_p6 = scmp.lt.s32.totalorder %s2971_s17, %s2966_s29 }
  0x68   : > { %p2969_p1 = pnand %p2967_p4, %p2788_p9  ;;  %p2974_p11 = por %p2973_p6, %p2972_p10 }
  0x6a   : > { %p2970_p7 = pneg %p2969_p1 }
  0x6c   : > { %p2975_p12 = pnand %p2974_p11, %p2970_p7 }
  0x6e   : > { %2978 = shalt.err (!%p2975_p12)
}
  0x6f   : > { %s3135_s23 = smov 16   ;;  %s3136_s27 = smov 1  }
  0x70   : > { %2568 = dma.hbm_to_vmem [thread:$0]  (!%p3302_p8), %s529_s25, 64, %s531_s19, %s3317_s13, %s3135_s23, %s3135_s23, %s3136_s27  }
  0x71   : > { %542 = sbr.rel (%p3238_p3) target bundleno = 956 (0x3bc), region = 72  ;;  %s3401_s12 = sand.u32 (!%p3238_p3), 1, %s3092_s26  }
  0x72   : > { %s1928_s1 = sshll.u32 (!%p3238_p3), %s3401_s12, 3  ;;  %s545_s6 = scalar_lea.sflag (!%p3238_p3), [#allocation4], %s3401_s12 }
  0x73   : > { %s3405_s8 = scalar_lea.vmem (!%p3238_p3), [#allocation3], %s1928_s1 }
  0x76   : > { %3059 = dma.done.wait (%p3284_p13), %s545_s6, 128  }
  0x77   : > { %3061 = vsyncadd (%p3284_p13), %s545_s6, 4294967168  ;;  %s554_s13 = sand.u32 1, %s3233_s15   ;;  %s558_s20 = scalar_lea.vmem [#allocation6], %s1928_s1 }
  0x78   : > { %s555_s16 = scalar_lea.sflag [#allocation7], %s554_s13 }
  0x79   : > { %3063 = dma.done.wait (%p3284_p13), %s555_s16, 192  }
  0x7a   : > { %3065 = vsyncadd (%p3284_p13), %s555_s16, 4294967104  ;;  %s1930_s22 = sshll.u32 %s3401_s12, 2  ;;  %p3788_p3 = scmp.eq.s32.totalorder %s3233_s15, 0 }
  0x7b   : > { %s3417_s25 = scalar_lea.vmem [#allocation8], %s1930_s22 }
  0x7c   : > { %3067 = dma.done.wait (%p3788_p3), [#allocation10], 33792   ;;  %p3789_p8 = pmov %p3788_p3 }
  0x7d   : > { %p3790_p9 = pmov %p3788_p3 }
  0x7e   : > { %3069 = vsyncadd (%p3789_p8), [#allocation10], 4294933504 }
  0x7f   : > { %3071 = dma.done.wait (%p3790_p9), [#allocation13], 8320   ;;  %p3791_p2 = pmov %p3788_p3 }
  0x81   : > { %3073 = vsyncadd (%p3791_p2), [#allocation13], 4294958976  ;;  %p3792_p4 = pmov %p3791_p2 }
  0x82   : > { %p3793_p13 = pmov %p3791_p2 }
  0x83   : > { %3075 = dma.done.wait (%p3792_p4), [#allocation16], 1152  }
  0x84   : > { %3077 = vsyncadd (%p3793_p13), [#allocation16], 4294966144  ;;  %p3794_p1 = pmov %p3791_p2 }
  0x86   : > { %3079 = dma.done.wait (%p3794_p1), [#allocation19], 1024   ;;  %p3795_p7 = pmov %p3794_p1 }
  0x87   : > { %s1938_s3 = sshll.u32 %s3401_s12, 4  ;;  %v749_v0 = vld [vmem:[%s558_s20] sm:$0xf]  ;;  %v750_v1 = vld [vmem:[%s558_s20 + $0x4] sm:$0xf]  ;;  %v2397_v2 = vld [vmem:[#allocation9 + $0x38] sm:$0xff] }
  0x88   : > { %3081 = vsyncadd (%p3795_p7), [#allocation19], 4294966272  ;;  %751 = vst [vmem:[#allocation2 + $0xc] sm:$0xf] %v749_v0  ;;  %733 = vmatpush.bf16.msra.mxu0 %v2397_v2  ;;  %v2396_v3 = vld [vmem:[#allocation9 + $0x30] sm:$0xff]  ;;  %v2395_v4 = vld [vmem:[#allocation9 + $0x28] sm:$0xff] }
  0x89   : > { %752 = vst [vmem:[#allocation2 + $0x1c] sm:$0xf] %v750_v1  ;;  %v2394_v5 = vld [vmem:[#allocation9 + $0x20] sm:$0xff]  ;;  %v2393_v6 = vld [vmem:[#allocation9 + $0x18] sm:$0xff]  ;;  %v2392_v7 = vld [vmem:[#allocation9 + $0x10] sm:$0xff]  ;;  %s3440_s30 = scalar_lea.vmem [#allocation20], %s1938_s3 }
  0x8a   : > { %v2391_v8 = vld [vmem:[#allocation9 + $0x8] sm:$0xff]  ;;  %v2390_v9 = vld [vmem:[#allocation9] sm:$0xff]  ;;  %v2678_v11 = vld [vmem:[%s3736_s4] ss:$0 sm:$0xff]  ;;  %v3442_v18 = vmov 0.0   ;;  %v3444_v19 = vmov 0.0  }
  0x8b   : > { %v2389_v10 = vld [vmem:[%s3405_s8] sm:$0xff]  ;;  %s3450_s29 = smov 0  }
  0x8c   : > { %734 = vmatpush.bf16.msra.mxu0 %v2396_v3 }
  0x90   : > { %735 = vmatpush.bf16.msra.mxu0 %v2395_v4 }
  0x94   : > { %736 = vmatpush.bf16.msra.mxu0 %v2394_v5 }
  0x98   : > { %737 = vmatpush.bf16.msra.mxu0 %v2393_v6 }
  0x9c   : > { %738 = vmatpush.bf16.msra.mxu0 %v2392_v7 }
  0xa0   : > { %739 = vmatpush.bf16.msra.mxu0 %v2391_v8 }
  0xa4   : > { %740 = vmatpush.bf16.msra.mxu0 %v2390_v9 }
  0xa7   : > { %741 = vmatmul.bf16.vlgmr.msra.gmra.mxu0 %v2389_v10 }
 0x124   : > { %v742_v12 = vpop.f32.mrf.mxu0 }
 0x125   : > { %v743_v13 = vadd.f32 %v2678_v11, %v742_v12 }
 0x127   : > { %v747_v14 = vmax.f32 %v743_v13, 0.0  }
 0x12c   : > { %v744_v15 = vpop.f32.mrf.mxu0 }
 0x12d   : > { %v745_v16 = vadd.f32 %v2678_v11, %v744_v15 }
 0x12f   : > { %v748_v17 = vmax.f32 %v745_v16, 0.0  }
 0x130 LB: >> { %s2402_s18 = sshll.u32 %s3120_s29, 9  ;;  %s763_s24 = scalar_lea.vmem %s3417_s25, %s3120_s29 [#allocation8]  ;;  %vm787_vm0 = vcmask 1046528   ;;  %vm776_vm1 = vcmask 1040384   ;;  %s3120_s29 = sphi %s3450_s29, %s758_s29   ;;  %v3116_v14 = vphi %v747_v14, %v1508_v14   ;;  %v3112_v17 = vphi %v748_v17, %v1509_v17   ;;  %v3108_v19 = vphi %v3444_v19, %v3797_v19   ;;  %v3104_v18 = vphi %v3442_v18, %v3796_v18  }
 0x131   : >> { %s3470_s17 = scalar_lea.vmem [#allocation11], %s2402_s18  ;;  %v2679_v13 = vld [vmem:[%s763_s24] ss:$0 sm:$0xff]  ;;  %s2467_s14 = sshll.u32 %s3120_s29, 7 }
 0x132   : >> { %v2052_v20 = vld [vmem:[%s3470_s17 + $0x70] sm:$0xf]  ;;  %v2418_v21 = vld [vmem:[%s3470_s17 + $0x74] sm:$0xf0]  ;;  %v2044_v31 = vld [vmem:[%s3470_s17 + $0x60] sm:$0xf] }
 0x133   : >> { %v2116_v22 = vld [vmem:[%s3470_s17 + $0xf0] sm:$0xf]  ;;  %v2053_v23 = vor.u32 %v2418_v21, %v2052_v20  ;;  %v2434_v24 = vld [vmem:[%s3470_s17 + $0xf4] sm:$0xf0]  ;;  %v2416_v33 = vld [vmem:[%s3470_s17 + $0x64] sm:$0xf0] }
 0x134   : >> { %v2180_v25 = vld [vmem:[%s3470_s17 + $0x170] sm:$0xf]  ;;  %v2450_v26 = vld [vmem:[%s3470_s17 + $0x174] sm:$0xf0]  ;;  %v2117_v27 = vor.u32 %v2434_v24, %v2116_v22  ;;  %v2108_v34 = vld [vmem:[%s3470_s17 + $0xe0] sm:$0xf]  ;;  %v2045_v36 = vor.u32 %v2416_v33, %v2044_v31 }
 0x135   : >> { %v2181_v28 = vor.u32 %v2450_v26, %v2180_v25  ;;  %v2244_v29 = vld [vmem:[%s3470_s17 + $0x1f0] sm:$0xf]  ;;  %v2466_v30 = vld [vmem:[%s3470_s17 + $0x1f4] sm:$0xf0]  ;;  %1217 = vmatpush.bf16.msra.mxu0 %v2053_v23  ;;  %v2432_v35 = vld [vmem:[%s3470_s17 + $0xe4] sm:$0xf0] }
 0x136   : >> { %v2245_v32 = vor.u32 %v2466_v30, %v2244_v29  ;;  %1231 = vmatpush.bf16.msra.mxu1 %v2117_v27  ;;  %v2109_v37 = vor.u32 %v2432_v35, %v2108_v34  ;;  %v2172_v38 = vld [vmem:[%s3470_s17 + $0x160] sm:$0xf]  ;;  %v2448_v39 = vld [vmem:[%s3470_s17 + $0x164] sm:$0xf0]  ;;  %v2036_v43 = vld [vmem:[%s3470_s17 + $0x50] sm:$0xf] }
 0x137   : >> { %1245 = vmatpush.bf16.msra.mxu2 %v2181_v28  ;;  %v2236_v40 = vld [vmem:[%s3470_s17 + $0x1e0] sm:$0xf]  ;;  %v2173_v41 = vor.u32 %v2448_v39, %v2172_v38  ;;  %v2464_v42 = vld [vmem:[%s3470_s17 + $0x1e4] sm:$0xf0]  ;;  %v2414_v44 = vld [vmem:[%s3470_s17 + $0x54] sm:$0xf0]  ;;  %v3530_v38 = vadd.f32 %v3112_v17, %v2679_v13 }
 0x138   : >> { %1259 = vmatpush.bf16.msra.mxu3 %v2245_v32  ;;  %v2237_v45 = vor.u32 %v2464_v42, %v2236_v40  ;;  %v2100_v46 = vld [vmem:[%s3470_s17 + $0xd0] sm:$0xf]  ;;  %v2430_v47 = vld [vmem:[%s3470_s17 + $0xd4] sm:$0xf0]  ;;  %v2037_v49 = vor.u32 %v2414_v44, %v2036_v43  ;;  %v2028_v55 = vld [vmem:[%s3470_s17 + $0x40] sm:$0xf]  ;;  %v768_v32 = vadd.f32 %v3116_v14, %v2679_v13 }
 0x139   : >> { %v2164_v48 = vld [vmem:[%s3470_s17 + $0x150] sm:$0xf]  ;;  %1218 = vmatpush.bf16.msra.mxu0 %v2045_v36  ;;  %v2446_v50 = vld [vmem:[%s3470_s17 + $0x154] sm:$0xf0]  ;;  %v2101_v53 = vor.u32 %v2430_v47, %v2100_v46  ;;  %v2412_v56 = vld [vmem:[%s3470_s17 + $0x44] sm:$0xf0] }
 0x13a   : >> { %v2228_v51 = vld [vmem:[%s3470_s17 + $0x1d0] sm:$0xf]  ;;  %v2462_v52 = vld [vmem:[%s3470_s17 + $0x1d4] sm:$0xf0]  ;;  %1232 = vmatpush.bf16.msra.mxu1 %v2109_v37  ;;  %v2165_v54 = vor.u32 %v2446_v50, %v2164_v48  ;;  %v2092_v57 = vld [vmem:[%s3470_s17 + $0xc0] sm:$0xf]  ;;  %v2029_v0 = vor.u32 %v2412_v56, %v2028_v55  ;;  %v770_v50 = vpack.c.bf16 %v768_v32, %v768_v32 }
 0x13b   : >> { %1246 = vmatpush.bf16.msra.mxu2 %v2173_v41  ;;  %v2229_v58 = vor.u32 %v2462_v52, %v2228_v51  ;;  %v2428_v59 = vld [vmem:[%s3470_s17 + $0xc4] sm:$0xf0]  ;;  %v2156_v60 = vld [vmem:[%s3470_s17 + $0x140] sm:$0xf]  ;;  %v2020_v3 = vld [vmem:[%s3470_s17 + $0x30] sm:$0xf] }
 0x13c   : >> { %1260 = vmatpush.bf16.msra.mxu3 %v2237_v45  ;;  %v2444_v61 = vld [vmem:[%s3470_s17 + $0x144] sm:$0xf0]  ;;  %v2220_v62 = vld [vmem:[%s3470_s17 + $0x1c0] sm:$0xf]  ;;  %v2093_v1 = vor.u32 %v2428_v59, %v2092_v57  ;;  %v2410_v4 = vld [vmem:[%s3470_s17 + $0x34] sm:$0xf0] }
 0x13d   : >> { %v2460_v63 = vld [vmem:[%s3470_s17 + $0x1c4] sm:$0xf0]  ;;  %1219 = vmatpush.bf16.msra.mxu0 %v2037_v49  ;;  %v2157_v2 = vor.u32 %v2444_v61, %v2156_v60  ;;  %v2084_v5 = vld [vmem:[%s3470_s17 + $0xb0] sm:$0xf]  ;;  %v2426_v7 = vld [vmem:[%s3470_s17 + $0xb4] sm:$0xf0]  ;;  %v2021_v12 = vor.u32 %v2410_v4, %v2020_v3 }
 0x13e   : >> { %1233 = vmatpush.bf16.msra.mxu1 %v2101_v53  ;;  %v2221_v6 = vor.u32 %v2460_v63, %v2220_v62  ;;  %v2148_v8 = vld [vmem:[%s3470_s17 + $0x130] sm:$0xf]  ;;  %v2442_v9 = vld [vmem:[%s3470_s17 + $0x134] sm:$0xf0]  ;;  %v2085_v15 = vor.u32 %v2426_v7, %v2084_v5  ;;  %v2012_v20 = vld [vmem:[%s3470_s17 + $0x20] sm:$0xf] }
 0x13f   : >> { %1247 = vmatpush.bf16.msra.mxu2 %v2165_v54  ;;  %v2212_v10 = vld [vmem:[%s3470_s17 + $0x1b0] sm:$0xf]  ;;  %v2458_v11 = vld [vmem:[%s3470_s17 + $0x1b4] sm:$0xf0]  ;;  %v2149_v16 = vor.u32 %v2442_v9, %v2148_v8  ;;  %v2408_v21 = vld [vmem:[%s3470_s17 + $0x24] sm:$0xf0] }
 0x140   : >> { %1261 = vmatpush.bf16.msra.mxu3 %v2229_v58  ;;  %v2076_v22 = vld [vmem:[%s3470_s17 + $0xa0] sm:$0xf]  ;;  %v2213_v23 = vor.u32 %v2458_v11, %v2212_v10  ;;  %v2424_v24 = vld [vmem:[%s3470_s17 + $0xa4] sm:$0xf0]  ;;  %v2013_v29 = vor.u32 %v2408_v21, %v2012_v20  ;;  %v2004_v30 = vld [vmem:[%s3470_s17 + $0x10] sm:$0xf] }
 0x141   : >> { %1220 = vmatpush.bf16.msra.mxu0 %v2029_v0  ;;  %v2140_v25 = vld [vmem:[%s3470_s17 + $0x120] sm:$0xf]  ;;  %v2440_v26 = vld [vmem:[%s3470_s17 + $0x124] sm:$0xf0]  ;;  %v2406_v31 = vld [vmem:[%s3470_s17 + $0x14] sm:$0xf0]  ;;  %v2077_v33 = vor.u32 %v2424_v24, %v2076_v22 }
 0x142   : >> { %1234 = vmatpush.bf16.msra.mxu1 %v2093_v1  ;;  %v2204_v27 = vld [vmem:[%s3470_s17 + $0x1a0] sm:$0xf]  ;;  %v2456_v28 = vld [vmem:[%s3470_s17 + $0x1a4] sm:$0xf0]  ;;  %v2141_v34 = vor.u32 %v2440_v26, %v2140_v25  ;;  %v2068_v35 = vld [vmem:[%s3470_s17 + $0x90] sm:$0xf]  ;;  %v2005_v46 = vor.u32 %v2406_v31, %v2004_v30  ;;  %v771_v25 = vpack.c.bf16 %v3530_v38, %v3530_v38 }
 0x143   : >> { %1248 = vmatpush.bf16.msra.mxu2 %v2157_v2  ;;  %v2422_v36 = vld [vmem:[%s3470_s17 + $0x94] sm:$0xf0]  ;;  %v2132_v37 = vld [vmem:[%s3470_s17 + $0x110] sm:$0xf]  ;;  %v2205_v39 = vor.u32 %v2456_v28, %v2204_v27  ;;  %v1996_v43 = vld [vmem:[%s3470_s17] sm:$0xf] }
 0x144   : >> { %1262 = vmatpush.bf16.msra.mxu3 %v2221_v6  ;;  %v2438_v40 = vld [vmem:[%s3470_s17 + $0x114] sm:$0xf0]  ;;  %v2196_v41 = vld [vmem:[%s3470_s17 + $0x190] sm:$0xf]  ;;  %v2404_v44 = vld [vmem:[%s3470_s17 + $0x4] sm:$0xf0]  ;;  %v2069_v51 = vor.u32 %v2422_v36, %v2068_v35 }
 0x145   : >> { %1221 = vmatpush.bf16.msra.mxu0 %v2021_v12  ;;  %v2454_v42 = vld [vmem:[%s3470_s17 + $0x194] sm:$0xf0]  ;;  %v2060_v45 = vld [vmem:[%s3470_s17 + $0x80] sm:$0xf]  ;;  %v2420_v47 = vld [vmem:[%s3470_s17 + $0x84] sm:$0xf0]  ;;  %v2133_v52 = vor.u32 %v2438_v40, %v2132_v37  ;;  %v1997_v0 = vor.u32 %v2404_v44, %v1996_v43 }
 0x146   : >> { %1235 = vmatpush.bf16.msra.mxu1 %v2085_v15  ;;  %v2124_v48 = vld [vmem:[%s3470_s17 + $0x100] sm:$0xf]  ;;  %v2436_v49 = vld [vmem:[%s3470_s17 + $0x104] sm:$0xf0]  ;;  %v2417_v55 = vld [vmem:[%s3470_s17 + $0x74] sm:$0xf]  ;;  %v2197_v59 = vor.u32 %v2454_v42, %v2196_v41  ;;  %v2061_v1 = vor.u32 %v2420_v47, %v2060_v45 }
 0x147   : >> { %1249 = vmatpush.bf16.msra.mxu2 %v2149_v16  ;;  %v2188_v53 = vld [vmem:[%s3470_s17 + $0x180] sm:$0xf]  ;;  %v2452_v54 = vld [vmem:[%s3470_s17 + $0x184] sm:$0xf0]  ;;  %v2054_v56 = vld [vmem:[%s3470_s17 + $0x78] sm:$0xf0]  ;;  %v2125_v12 = vor.u32 %v2436_v49, %v2124_v48 }
 0x148   : >> { %1263 = vmatpush.bf16.msra.mxu3 %v2213_v23  ;;  %v788_v57 = vrot.slane %v768_v32, 1  ;;  %v789_v58 = vrot.slane %v3530_v38, 1  ;;  %v2433_v60 = vld [vmem:[%s3470_s17 + $0xf4] sm:$0xf]  ;;  %v2118_v61 = vld [vmem:[%s3470_s17 + $0xf8] sm:$0xf0]  ;;  %v2189_v21 = vor.u32 %v2452_v54, %v2188_v53  ;;  %v2057_v22 = vor.u32 %v2417_v55, %v2054_v56 }
 0x149   : >> { %1222 = vmatpush.bf16.msra.mxu0 %v2013_v29  ;;  %v777_v62 = vrot.slane %v768_v32, 7  ;;  %v778_v63 = vrot.slane %v3530_v38, 7  ;;  %v2449_v2 = vld [vmem:[%s3470_s17 + $0x174] sm:$0xf]  ;;  %v2182_v3 = vld [vmem:[%s3470_s17 + $0x178] sm:$0xf0]  ;;  %v2121_v26 = vor.u32 %v2433_v60, %v2118_v61 }
 0x14a   : >> { %1236 = vmatpush.bf16.msra.mxu1 %v2077_v33  ;;  %v790_v4 = vsel %vm787_vm0, %v788_v57, %v789_v58  ;;  %v793_v5 = vsel %vm787_vm0, %v789_v58, 0.0  ;;  %v2465_v6 = vld [vmem:[%s3470_s17 + $0x1f4] sm:$0xf]  ;;  %v2246_v7 = vld [vmem:[%s3470_s17 + $0x1f8] sm:$0xf0]  ;;  %v2185_v27 = vor.u32 %v2449_v2, %v2182_v3  ;;  %s1977_s10 = sshll.u32 %s3120_s29, 1 }
 0x14b   : >> { %1250 = vmatpush.bf16.msra.mxu2 %v2141_v34  ;;  %v794_v8 = vpack.c.bf16 %v790_v4, %v790_v4  ;;  %v795_v9 = vpack.c.bf16 %v793_v5, %v793_v5  ;;  %v779_v10 = vsel %vm776_vm1, %v777_v62, %v778_v63  ;;  %v782_v11 = vsel %vm776_vm1, 0.0, %v777_v62  ;;  %v2399_v16 = vld [vmem:[#allocation2 + $0xc] sm:$0xf]  ;;  %v1990_v20 = vld [vmem:[#allocation2 + $0x18] sm:$0xf0]  ;;  %s3633_s23 = scalar_lea.vmem [#allocation14], %s2467_s14 }
 0x14c   : >> { %1264 = vmatpush.bf16.msra.mxu3 %v2205_v39  ;;  %v783_v13 = vpack.c.bf16 %v782_v11, %v782_v11  ;;  %v784_v15 = vpack.c.bf16 %v779_v10, %v779_v10  ;;  %772 = vst [vmem:[#allocation2 + $0x4] sm:$0xf] %v770_v50  ;;  %v2415_v23 = vld [vmem:[%s3470_s17 + $0x64] sm:$0xf]  ;;  %v2046_v24 = vld [vmem:[%s3470_s17 + $0x68] sm:$0xf0]  ;;  %v2249_v30 = vor.u32 %v2465_v6, %v2246_v7 }
 0x14d   : >> { %1223 = vmatpush.bf16.msra.mxu0 %v2005_v46  ;;  %796 = vst [vmem:[#allocation2 + $0x8] sm:$0xf] %v794_v8  ;;  %v2431_v28 = vld [vmem:[%s3470_s17 + $0xe4] sm:$0xf]  ;;  %v2110_v29 = vld [vmem:[%s3470_s17 + $0xe8] sm:$0xf0]  ;;  %v3565_v33 = vor.u32 %v2399_v16, %v1990_v20  ;;  %v2049_v36 = vor.u32 %v2415_v23, %v2046_v24 }
 0x14e   : >> { %1237 = vmatpush.bf16.msra.mxu1 %v2069_v51  ;;  %797 = vst [vmem:[#allocation2 + $0x18] sm:$0xf] %v795_v9  ;;  %v2447_v31 = vld [vmem:[%s3470_s17 + $0x164] sm:$0xf]  ;;  %v2174_v32 = vld [vmem:[%s3470_s17 + $0x168] sm:$0xf0]  ;;  %v2113_v37 = vor.u32 %v2431_v28, %v2110_v29 }
 0x14f   : >> { %1251 = vmatpush.bf16.msra.mxu2 %v2133_v52  ;;  %785 = vst [vmem:[#allocation2] sm:$0xf] %v783_v13  ;;  %v2463_v34 = vld [vmem:[%s3470_s17 + $0x1e4] sm:$0xf]  ;;  %v2238_v35 = vld [vmem:[%s3470_s17 + $0x1e8] sm:$0xf0]  ;;  %v2177_v38 = vor.u32 %v2447_v31, %v2174_v32 }
 0x150   : >> { %1265 = vmatpush.bf16.msra.mxu3 %v2197_v59  ;;  %786 = vst [vmem:[#allocation2 + $0x10] sm:$0xf] %v784_v15  ;;  %v2413_v39 = vld [vmem:[%s3470_s17 + $0x54] sm:$0xf]  ;;  %v2038_v40 = vld [vmem:[%s3470_s17 + $0x58] sm:$0xf0]  ;;  %v2241_v41 = vor.u32 %v2463_v34, %v2238_v35 }
 0x151   : >> { %1224 = vmatpush.bf16.msra.mxu0 %v1997_v0  ;;  %773 = vst [vmem:[#allocation2 + $0x14] sm:$0xf] %v771_v25  ;;  %v2429_v42 = vld [vmem:[%s3470_s17 + $0xd4] sm:$0xf]  ;;  %v2102_v43 = vld [vmem:[%s3470_s17 + $0xd8] sm:$0xf0]  ;;  %v2041_v49 = vor.u32 %v2413_v39, %v2038_v40 }
 0x152   : >> { %1238 = vmatpush.bf16.msra.mxu1 %v2061_v1  ;;  %v2445_v44 = vld [vmem:[%s3470_s17 + $0x154] sm:$0xf]  ;;  %v2166_v46 = vld [vmem:[%s3470_s17 + $0x158] sm:$0xf0]  ;;  %v2411_v51 = vld [vmem:[%s3470_s17 + $0x44] sm:$0xf]  ;;  %v2105_v55 = vor.u32 %v2429_v42, %v2102_v43 }
 0x153   : >> { %1252 = vmatpush.bf16.msra.mxu2 %v2125_v12  ;;  %v2461_v47 = vld [vmem:[%s3470_s17 + $0x1d4] sm:$0xf]  ;;  %v2230_v50 = vld [vmem:[%s3470_s17 + $0x1d8] sm:$0xf0]  ;;  %v2398_v54 = vld [vmem:[#allocation2 + $0x4] sm:$0xf]  ;;  %v2169_v58 = vor.u32 %v2445_v44, %v2166_v46 }
 0x154   : >> { %1266 = vmatpush.bf16.msra.mxu3 %v2189_v21  ;;  %v1988_v45 = vld [vmem:[#allocation2 + $0x8] sm:$0xf]  ;;  %v2030_v56 = vld [vmem:[%s3470_s17 + $0x48] sm:$0xf0]  ;;  %v2427_v59 = vld [vmem:[%s3470_s17 + $0xc4] sm:$0xf]  ;;  %v2233_v63 = vor.u32 %v2461_v47, %v2230_v50 }
 0x155   : >> { %1273 = vmatpush.bf16.msrb.mxu0 %v2057_v22  ;;  %v2401_v48 = vld [vmem:[#allocation2 + $0x14] sm:$0xf0]  ;;  %v2094_v60 = vld [vmem:[%s3470_s17 + $0xc8] sm:$0xf0]  ;;  %v2443_v0 = vld [vmem:[%s3470_s17 + $0x144] sm:$0xf]  ;;  %v2033_v3 = vor.u32 %v2411_v51, %v2030_v56 }
 0x156   : >> { %1287 = vmatpush.bf16.msrb.mxu1 %v2121_v26  ;;  %v3579_v52 = vor.u32 %v2401_v48, %v1988_v45  ;;  %v1980_v53 = vld [vmem:[#allocation2] sm:$0xf]  ;;  %v2158_v1 = vld [vmem:[%s3470_s17 + $0x148] sm:$0xf0]  ;;  %v2459_v4 = vld [vmem:[%s3470_s17 + $0x1c4] sm:$0xf]  ;;  %v2097_v6 = vor.u32 %v2427_v59, %v2094_v60 }
 0x157   : >> { %1301 = vmatpush.bf16.msrb.mxu2 %v2185_v27  ;;  %1267 = vmatmul.bf16.vlgmr.msra.gmra.mxu3 %v3565_v33  ;;  %v2400_v57 = vld [vmem:[#allocation2 + $0xc] sm:$0xf0]  ;;  %v2222_v5 = vld [vmem:[%s3470_s17 + $0x1c8] sm:$0xf0]  ;;  %v2409_v7 = vld [vmem:[%s3470_s17 + $0x34] sm:$0xf]  ;;  %v2161_v9 = vor.u32 %v2443_v0, %v2158_v1 }
 0x158   : >> { %1315 = vmatpush.bf16.msrb.mxu3 %v2249_v30  ;;  %1253 = vmatmul.bf16.vlgmr.msra.gmra.mxu2 %v3579_v52  ;;  %v3585_v61 = vor.u32 %v2400_v57, %v1980_v53  ;;  %v1982_v62 = vld [vmem:[#allocation2 + $0x10] sm:$0xf0]  ;;  %v2022_v8 = vld [vmem:[%s3470_s17 + $0x38] sm:$0xf0]  ;;  %v2225_v12 = vor.u32 %v2459_v4, %v2222_v5  ;;  %v2407_v23 = vld [vmem:[%s3470_s17 + $0x24] sm:$0xf] }
 0x159   : >> { %1274 = vmatpush.bf16.msrb.mxu0 %v2049_v36  ;;  %v3589_v2 = vor.u32 %v2398_v54, %v1982_v62  ;;  %v2425_v10 = vld [vmem:[%s3470_s17 + $0xb4] sm:$0xf]  ;;  %v2086_v11 = vld [vmem:[%s3470_s17 + $0xb8] sm:$0xf0]  ;;  %v2025_v16 = vor.u32 %v2409_v7, %v2022_v8  ;;  %v2014_v24 = vld [vmem:[%s3470_s17 + $0x28] sm:$0xf0] }
 0x15a   : >> { %1288 = vmatpush.bf16.msrb.mxu1 %v2113_v37  ;;  %1225 = vmatmul.bf16.vlgmr.msra.gmra.mxu0 %v3585_v61  ;;  %v2441_v13 = vld [vmem:[%s3470_s17 + $0x134] sm:$0xf]  ;;  %v2150_v15 = vld [vmem:[%s3470_s17 + $0x138] sm:$0xf0]  ;;  %v2089_v22 = vor.u32 %v2425_v10, %v2086_v11  ;;  %v2423_v26 = vld [vmem:[%s3470_s17 + $0xa4] sm:$0xf]  ;;  %v2017_v31 = vor.u32 %v2407_v23, %v2014_v24 }
 0x15b   : >> { %1302 = vmatpush.bf16.msrb.mxu2 %v2177_v38  ;;  %1239 = vmatmul.bf16.vlgmr.msra.gmra.mxu1 %v3589_v2  ;;  %v2457_v20 = vld [vmem:[%s3470_s17 + $0x1b4] sm:$0xf]  ;;  %v2214_v21 = vld [vmem:[%s3470_s17 + $0x1b8] sm:$0xf0]  ;;  %v2153_v25 = vor.u32 %v2441_v13, %v2150_v15  ;;  %v2078_v27 = vld [vmem:[%s3470_s17 + $0xa8] sm:$0xf0] }
 0x15c   : >> { %1316 = vmatpush.bf16.msrb.mxu3 %v2241_v41  ;;  %v2217_v28 = vor.u32 %v2457_v20, %v2214_v21  ;;  %v2439_v29 = vld [vmem:[%s3470_s17 + $0x124] sm:$0xf]  ;;  %v2142_v30 = vld [vmem:[%s3470_s17 + $0x128] sm:$0xf0]  ;;  %v2081_v35 = vor.u32 %v2423_v26, %v2078_v27  ;;  %v2405_v36 = vld [vmem:[%s3470_s17 + $0x14] sm:$0xf] }
 0x15d   : >> { %1275 = vmatpush.bf16.msrb.mxu0 %v2041_v49  ;;  %v2455_v32 = vld [vmem:[%s3470_s17 + $0x1a4] sm:$0xf]  ;;  %v2206_v34 = vld [vmem:[%s3470_s17 + $0x1a8] sm:$0xf0]  ;;  %v2006_v37 = vld [vmem:[%s3470_s17 + $0x18] sm:$0xf0]  ;;  %v2145_v38 = vor.u32 %v2439_v29, %v2142_v30 }
 0x15e   : >> { %1289 = vmatpush.bf16.msrb.mxu1 %v2105_v55  ;;  %v2421_v39 = vld [vmem:[%s3470_s17 + $0x94] sm:$0xf]  ;;  %v2070_v40 = vld [vmem:[%s3470_s17 + $0x98] sm:$0xf0]  ;;  %v2209_v41 = vor.u32 %v2455_v32, %v2206_v34  ;;  %v2009_v44 = vor.u32 %v2405_v36, %v2006_v37  ;;  %v2403_v48 = vld [vmem:[%s3470_s17 + $0x4] sm:$0xf] }
 0x15f   : >> { %1303 = vmatpush.bf16.msrb.mxu2 %v2169_v58  ;;  %v2437_v42 = vld [vmem:[%s3470_s17 + $0x114] sm:$0xf]  ;;  %v2134_v43 = vld [vmem:[%s3470_s17 + $0x118] sm:$0xf0]  ;;  %v2073_v47 = vor.u32 %v2421_v39, %v2070_v40  ;;  %v1998_v49 = vld [vmem:[%s3470_s17 + $0x8] sm:$0xf0] }
 0x160   : >> { %1317 = vmatpush.bf16.msrb.mxu3 %v2233_v63  ;;  %v2453_v45 = vld [vmem:[%s3470_s17 + $0x194] sm:$0xf]  ;;  %v2198_v46 = vld [vmem:[%s3470_s17 + $0x198] sm:$0xf0]  ;;  %v2137_v50 = vor.u32 %v2437_v42, %v2134_v43  ;;  %v2419_v51 = vld [vmem:[%s3470_s17 + $0x84] sm:$0xf]  ;;  %v2001_v57 = vor.u32 %v2403_v48, %v1998_v49 }
 0x161   : >> { %1276 = vmatpush.bf16.msrb.mxu0 %v2033_v3  ;;  %v2062_v53 = vld [vmem:[%s3470_s17 + $0x88] sm:$0xf0]  ;;  %v2201_v54 = vor.u32 %v2453_v45, %v2198_v46  ;;  %v2435_v55 = vld [vmem:[%s3470_s17 + $0x104] sm:$0xf]  ;;  %v2312_v0 = vld [vmem:[%s3633_s23 + $0x70] sm:$0xf] }
 0x162   : >> { %1290 = vmatpush.bf16.msrb.mxu1 %v2097_v6  ;;  %v2126_v56 = vld [vmem:[%s3470_s17 + $0x108] sm:$0xf0]  ;;  %v2451_v58 = vld [vmem:[%s3470_s17 + $0x184] sm:$0xf]  ;;  %v2065_v60 = vor.u32 %v2419_v51, %v2062_v53  ;;  %v2482_v1 = vld [vmem:[%s3633_s23 + $0x74] sm:$0xf] }
 0x163   : >> { %1304 = vmatpush.bf16.msrb.mxu2 %v2161_v9  ;;  %v2190_v59 = vld [vmem:[%s3470_s17 + $0x188] sm:$0xf0]  ;;  %v2129_v62 = vor.u32 %v2435_v55, %v2126_v56  ;;  %s870_s27 = scalar_lea.vmem [#allocation12], %s1977_s10  ;;  %v2304_v4 = vld [vmem:[%s3633_s23 + $0x60] sm:$0xf]  ;;  %s1348_s1 = scalar_lea.vmem [#allocation15], %s1977_s10 }
 0x164   : >> { %1318 = vmatpush.bf16.msrb.mxu3 %v2225_v12  ;;  %v2193_v63 = vor.u32 %v2451_v58, %v2190_v59  ;;  %v3641_v3 = vld [vmem:[%s870_s27] sm:$0x3]  ;;  %v2481_v5 = vld [vmem:[%s3633_s23 + $0x64] sm:$0xf0]  ;;  %v2480_v6 = vld [vmem:[%s3633_s23 + $0x64] sm:$0xf] }
 0x165   : >> { %1277 = vmatpush.bf16.msrb.mxu0 %v2025_v16  ;;  %v2305_v7 = vor.u32 %v2481_v5, %v2304_v4  ;;  %v2306_v8 = vld [vmem:[%s3633_s23 + $0x68] sm:$0xf0]  ;;  %v873_v9 = vperm.slane %v3641_v3, 0  ;;  %v2296_v11 = vld [vmem:[%s3633_s23 + $0x50] sm:$0xf]  ;;  %s758_s29 = sadd.s32 1, %s3120_s29  }
 0x166   : >> { %1291 = vmatpush.bf16.msrb.mxu1 %v2089_v22  ;;  %v2309_v10 = vor.u32 %v2480_v6, %v2306_v8  ;;  %v2479_v12 = vld [vmem:[%s3633_s23 + $0x54] sm:$0xf0]  ;;  %v2478_v13 = vld [vmem:[%s3633_s23 + $0x54] sm:$0xf]  ;;  %v2298_v20 = vld [vmem:[%s3633_s23 + $0x58] sm:$0xf0] }
 0x167   : >> { %1305 = vmatpush.bf16.msrb.mxu2 %v2153_v25  ;;  %v2297_v16 = vor.u32 %v2479_v12, %v2296_v11  ;;  %v2301_v23 = vor.u32 %v2478_v13, %v2298_v20  ;;  %v2288_v26 = vld [vmem:[%s3633_s23 + $0x40] sm:$0xf]  ;;  %v2477_v27 = vld [vmem:[%s3633_s23 + $0x44] sm:$0xf0]  ;;  %v2280_v36 = vld [vmem:[%s3633_s23 + $0x30] sm:$0xf] }
 0x168   : >> { %1319 = vmatpush.bf16.msrb.mxu3 %v2217_v28  ;;  %v2476_v28 = vld [vmem:[%s3633_s23 + $0x44] sm:$0xf]  ;;  %v2289_v30 = vor.u32 %v2477_v27, %v2288_v26  ;;  %v2475_v37 = vld [vmem:[%s3633_s23 + $0x34] sm:$0xf0]  ;;  %v2473_v48 = vld [vmem:[%s3633_s23 + $0x24] sm:$0xf0] }
 0x169   : >> { %1278 = vmatpush.bf16.msrb.mxu0 %v2017_v31  ;;  %v2290_v31 = vld [vmem:[%s3633_s23 + $0x48] sm:$0xf0]  ;;  %v2281_v40 = vor.u32 %v2475_v37, %v2280_v36  ;;  %v2472_v49 = vld [vmem:[%s3633_s23 + $0x24] sm:$0xf]  ;;  %v2264_v58 = vld [vmem:[%s3633_s23 + $0x10] sm:$0xf] }
 0x16a   : >> { %1292 = vmatpush.bf16.msrb.mxu1 %v2081_v35  ;;  %v2293_v34 = vor.u32 %v2476_v28, %v2290_v31  ;;  %v2471_v59 = vld [vmem:[%s3633_s23 + $0x14] sm:$0xf0]  ;;  %v2468_v5 = vld [vmem:[%s3633_s23 + $0x4] sm:$0xf]  ;;  %v2258_v6 = vld [vmem:[%s3633_s23 + $0x8] sm:$0xf0] }
 0x16b   : >> { %1306 = vmatpush.bf16.msrb.mxu2 %v2145_v38  ;;  %v2474_v38 = vld [vmem:[%s3633_s23 + $0x34] sm:$0xf]  ;;  %v2261_v8 = vor.u32 %v2468_v5, %v2258_v6  ;;  %p755_p10 = scmp.ge.s32.totalorder %s758_s29, 4  }
 0x16c   : >> { %1320 = vmatpush.bf16.msrb.mxu3 %v2209_v41  ;;  %v2282_v41 = vld [vmem:[%s3633_s23 + $0x38] sm:$0xf0]  ;;  %s3798_s13 = sld [smem:[#allocation38_spill]] (%p755_p10)  ;;  %s2500_s25 = sshll.u32 (%p755_p10), %s3233_s15, 4 }
 0x16d   : >> { %1279 = vmatpush.bf16.msrb.mxu0 %v2009_v44  ;;  %v2285_v45 = vor.u32 %v2474_v38, %v2282_v41  ;;  %s3799_s22 = sld [smem:[#allocation39_spill]] (%p755_p10)  ;;  %s1697_s24 = sshll.u32 (%p755_p10), %s3440_s30, 4  ;;  %s1698_s24 = int_to_ptr.vmem [resolvable:$true] %s1697_s24 }
 0x16e   : >> { %1293 = vmatpush.bf16.msrb.mxu1 %v2073_v47  ;;  %v2272_v47 = vld [vmem:[%s3633_s23 + $0x20] sm:$0xf]  ;;  %s3801_s29 = sld [smem:[#allocation40_spill]] (%p755_p10)  ;;  %s1685_s14 = scalar_lea.sflag (%p755_p10), [#allocation5], %s3401_s12 }
 0x16f   : >> { %1307 = vmatpush.bf16.msrb.mxu2 %v2137_v50  ;;  %v2273_v53 = vor.u32 %v2473_v48, %v2272_v47 }
 0x170   : >> { %1321 = vmatpush.bf16.msrb.mxu3 %v2201_v54  ;;  %v2274_v54 = vld [vmem:[%s3633_s23 + $0x28] sm:$0xf0] }
 0x171   : >> { %1280 = vmatpush.bf16.msrb.mxu0 %v2001_v57  ;;  %v2277_v56 = vor.u32 %v2472_v49, %v2274_v54 }
 0x172   : >> { %1294 = vmatpush.bf16.msrb.mxu1 %v2065_v60  ;;  %v2470_v60 = vld [vmem:[%s3633_s23 + $0x14] sm:$0xf] }
 0x173   : >> { %1308 = vmatpush.bf16.msrb.mxu2 %v2129_v62  ;;  %v2265_v62 = vor.u32 %v2471_v59, %v2264_v58 }
 0x174   : >> { %1322 = vmatpush.bf16.msrb.mxu3 %v2193_v63  ;;  %1281 = vmatmul.bf16.vlgmr.msrb.gmra.mxu0 %v3585_v61  ;;  %v2483_v61 = vld [vmem:[%s3633_s23 + $0x74] sm:$0xf0]  ;;  %v2266_v63 = vld [vmem:[%s3633_s23 + $0x18] sm:$0xf0]  ;;  %s1696_s18 = scalar_lea.hbm (%p755_p10), %s3801_s29, %s2500_s25 }
 0x175   : >> { %1295 = vmatmul.bf16.vlgmr.msrb.gmra.mxu1 %v3589_v2  ;;  %v2313_v2 = vor.u32 %v2483_v61, %v2312_v0  ;;  %s1699_s17 = sshll.u32 (%p755_p10), %s1696_s18, 4  ;;  %s1700_s17 = int_to_ptr.hbm [resolvable:$true] %s1699_s17 }
 0x176   : >> { %1309 = vmatmul.bf16.vlgmr.msrb.gmra.mxu2 %v3579_v52  ;;  %v2314_v52 = vld [vmem:[%s3633_s23 + $0x78] sm:$0xf0]  ;;  %s3008_s10 = sshra.s32 (%p755_p10), %s1700_s17, 4  ;;  %s3009_s10 = int_to_ptr.hbm [resolvable:$true] %s3008_s10 }
 0x177   : >> { %1323 = vmatmul.bf16.vlgmr.msrb.gmra.mxu3 %v3565_v33  ;;  %v2317_v33 = vor.u32 %v2482_v1, %v2314_v52  ;;  %1478 = vmatpush.bf16.msra.mxu0 %v2313_v2  ;;  %v2269_v1 = vor.u32 %v2470_v60, %v2266_v63  ;;  %v2256_v52 = vld [vmem:[%s3633_s23] sm:$0xf]  ;;  %p3015_p3 = scmp.lt.s32.totalorder (%p755_p10), %s3009_s10, %s3801_s29 }
 0x179   : >> { %1492 = vmatpush.bf16.msra.mxu1 %v2317_v33  ;;  %v2469_v33 = vld [vmem:[%s3633_s23 + $0x4] sm:$0xf0]  ;;  %s3010_s23 = scalar_lea.hbm (%p755_p10), %s3009_s10, 16 }
 0x17a   : >> { %v2257_v4 = vor.u32 %v2469_v33, %v2256_v52  ;;  %p3011_p6 = scmp.ne.s32.totalorder (%p755_p10), %s3009_s10, %s3010_s23 }
 0x17b   : >> { %1479 = vmatpush.bf16.msra.mxu0 %v2305_v7  ;;  %v874_v7 = vperm.slane %v3641_v3, 1 }
 0x17c   : > { %p3012_p11 = pnand (%p755_p10), %p3011_p6, %p3288_p0 }
 0x17d   : >> { %1493 = vmatpush.bf16.msra.mxu1 %v2309_v10 }
 0x17e   : > { %p3013_p12 = pneg (%p755_p10), %p3012_p11 }
 0x17f   : >> { %1480 = vmatpush.bf16.msra.mxu0 %v2297_v16 }
 0x181   : >> { %1494 = vmatpush.bf16.msra.mxu1 %v2301_v23 }
 0x183   : >> { %1481 = vmatpush.bf16.msra.mxu0 %v2289_v30 }
 0x185   : >> { %1495 = vmatpush.bf16.msra.mxu1 %v2293_v34 }
 0x187   : >> { %1482 = vmatpush.bf16.msra.mxu0 %v2281_v40 }
 0x189   : >> { %1496 = vmatpush.bf16.msra.mxu1 %v2285_v45 }
 0x18b   : >> { %1483 = vmatpush.bf16.msra.mxu0 %v2273_v53 }
 0x18d   : >> { %1497 = vmatpush.bf16.msra.mxu1 %v2277_v56 }
 0x18f   : >> { %1484 = vmatpush.bf16.msra.mxu0 %v2265_v62 }
 0x191   : >> { %1498 = vmatpush.bf16.msra.mxu1 %v2269_v1 }
 0x193   : >> { %1485 = vmatpush.bf16.msra.mxu0 %v2257_v4 }
 0x195   : >> { %1499 = vmatpush.bf16.msra.mxu1 %v2261_v8  ;;  %v2490_v8 = vld [vmem:[#allocation17 + $0x30] sm:$0xff] (%p755_p10) }
 0x1d7   : >> { %v1226_v15 = vpop.f32.mrf.mxu0 }
 0x1d8   : >> { %v1227_v21 = vadd.f32 %v1226_v15, %v873_v9  ;;  %v1240_v22 = vpop.f32.mrf.mxu1 }
 0x1da   : >> { %v1268_v24 = vpop.f32.mrf.mxu3  ;;  %v1241_v25 = vadd.f32 %v1240_v22, %v1227_v21 }
 0x1db   : >> { %v1254_v29 = vpop.f32.mrf.mxu2 }
 0x1dc   : >> { %v1255_v32 = vadd.f32 %v1254_v29, %v1241_v25 }
 0x1de   : >> { %v1269_v35 = vadd.f32 %v1268_v24, %v1255_v32 }
 0x1df   : >> { %v1228_v39 = vpop.f32.mrf.mxu0 }
 0x1e0   : >> { %v2252_v42 = vmul.f32 -1.442695, %v1269_v35  ;;  %v1229_v43 = vadd.f32 %v1228_v39, %v873_v9  ;;  %v1242_v44 = vpop.f32.mrf.mxu1 }
 0x1e2   : >> { %2680 = vpow2.f32 %v2252_v42  ;;  %v1243_v46 = vadd.f32 %v1242_v44, %v1229_v43  ;;  %v1270_v51 = vpop.f32.mrf.mxu3 }
 0x1e3   : >> { %v1256_v50 = vpop.f32.mrf.mxu2 }
 0x1e4   : >> { %v1257_v55 = vadd.f32 %v1256_v50, %v1243_v46 }
 0x1e6   : >> { %v1271_v57 = vadd.f32 %v1270_v51, %v1257_v55 }
 0x1e8   : >> { %v2681_v0 = vpop.eup %2680  ;;  %v2253_v61 = vmul.f32 -1.442695, %v1271_v57  ;;  %v1349_v57 = vld [vmem:[%s1348_s1] sm:$0x3]  ;;  %s3014_s1 = scalar_lea.hbm (%p755_p10), %s3801_s29, 32 }
 0x1e9   : >> { %v1356_v2 = vadd.f32 1.0, %v2681_v0  ;;  %v1394_v58 = vperm.slane %v1349_v57, 0  ;;  %v1395_v59 = vperm.slane %v1349_v57, 1  ;;  %p3016_p8 = scmp.lt.s32.totalorder (%p755_p10), %s3014_s1, %s3010_s23 }
 0x1ea   : >> { %2682 = vpow2.f32 %v2253_v61 }
 0x1eb   : >> { %2684 = vrcp.f32 %v1356_v2  ;;  %vm1363_vm2 = vweird.f32 %v1356_v2  ;;  %v1369_v41 = vand.u32 2147483648, %v1356_v2  ;;  %v1367_v43 = vand.u32 2147483647, %v1356_v2  ;;  %p3017_p9 = por (%p755_p10), %p3016_p8, %p3015_p3 }
 0x1ed   : >> { %v1370_v48 = vor.u32 1.1754944e-38, %v1369_v41  ;;  %vm1368_vm8 = vcmp.eq.f32.partialorder %v1367_v43, 8.507059e+37  ;;  %p3018_p2 = pnand (%p755_p10), %p3017_p9, %p3013_p12 }
 0x1f0   : >> { %v2683_v10 = vpop.eup %2682 }
 0x1f1   : >> { %v1282_v9 = vpop.f32.mrf.mxu0  ;;  %v1357_v12 = vadd.f32 1.0, %v2683_v10  ;;  %v2685_v15 = vpop.eup %2684  ;;  %v2498_v10 = vld [vmem:[#allocation18 + $0x30] sm:$0xff] (%p755_p10) }
 0x1f2   : >> { %v1283_v11 = vadd.f32 %v1282_v9, %v874_v7  ;;  %v1296_v13 = vpop.f32.mrf.mxu1  ;;  %v1359_v20 = vmul.f32 %v2685_v15, %v1356_v2  ;;  %vm1364_vm3 = vweird.f32 %v2685_v15  ;;  %v2499_v9 = vld [vmem:[#allocation18 + $0x38] sm:$0xff] (%p755_p10) }
 0x1f3   : >> { %2686 = vrcp.f32 %v1357_v12  ;;  %v1384_v42 = vand.u32 2147483648, %v1357_v12  ;;  %vm1365_vm5 = vmor %vm1363_vm2, %vm1364_vm3  ;;  %vm1378_vm6 = vweird.f32 %v1357_v12  ;;  %v1382_v44 = vand.u32 2147483647, %v1357_v12 }
 0x1f4   : >> { %v1297_v16 = vadd.f32 %v1296_v13, %v1283_v11  ;;  %v1360_v27 = vsub.f32 1.0, %v1359_v20  ;;  %v2489_v11 = vld [vmem:[#allocation17 + $0x28] sm:$0xff] (%p755_p10)  ;;  %v2488_v13 = vld [vmem:[#allocation17 + $0x20] sm:$0xff] (%p755_p10) }
 0x1f5   : >> { %v1385_v49 = vor.u32 1.1754944e-38, %v1384_v42  ;;  %vm1383_vm9 = vcmp.eq.f32.partialorder %v1382_v44, 8.507059e+37  ;;  %v2484_v20 = vld [vmem:[#allocation17] sm:$0xff] (%p755_p10) }
 0x1f6   : >> { %v1361_v32 = vmul.f32 %v2685_v15, %v1360_v27  ;;  %v2692_v27 = vld [vmem:[%s3798_s13] ss:$0 sm:$0xff] (%p755_p10) }
 0x1f8   : >> { %v1362_v39 = vadd.f32 %v2685_v15, %v1361_v32 }
 0x1f9   : >> { %v1310_v21 = vpop.f32.mrf.mxu2  ;;  %v1284_v22 = vpop.f32.mrf.mxu0 }
 0x1fa   : >> { %v1324_v23 = vpop.f32.mrf.mxu3  ;;  %v1311_v24 = vadd.f32 %v1310_v21, %v1297_v16  ;;  %v1285_v25 = vadd.f32 %v1284_v22, %v874_v7  ;;  %v2687_v26 = vpop.eup %2686  ;;  %v1366_v45 = vsel %vm1365_vm5, %v2685_v15, %v1362_v39  ;;  %v2491_v7 = vld [vmem:[#allocation17 + $0x38] sm:$0xff] (%p755_p10)  ;;  %v2496_v15 = vld [vmem:[#allocation18 + $0x20] sm:$0xff] (%p755_p10) }
 0x1fb   : >> { %v1374_v3 = vmul.f32 %v2687_v26, %v1357_v12  ;;  %v1298_v28 = vpop.f32.mrf.mxu1  ;;  %vm1379_vm4 = vweird.f32 %v2687_v26  ;;  %v1371_v51 = vsel %vm1368_vm8, %v1370_v48, %v1366_v45  ;;  %v2497_v12 = vld [vmem:[#allocation18 + $0x28] sm:$0xff] (%p755_p10)  ;;  %v2487_v16 = vld [vmem:[#allocation17 + $0x18] sm:$0xff] (%p755_p10) }
 0x1fc   : >> { %v1325_v30 = vadd.f32 %v1324_v23, %v1311_v24  ;;  %v1299_v31 = vadd.f32 %v1298_v28, %v1285_v25  ;;  %vm1380_vm7 = vmor %vm1378_vm6, %vm1379_vm4  ;;  %v2495_v22 = vld [vmem:[#allocation18 + $0x18] sm:$0xff] (%p755_p10)  ;;  %v2494_v23 = vld [vmem:[#allocation18 + $0x10] sm:$0xff] (%p755_p10) }
 0x1fd   : >> { %v1375_v29 = vsub.f32 1.0, %v1374_v3  ;;  %v2493_v24 = vld [vmem:[#allocation18 + $0x8] sm:$0xff] (%p755_p10)  ;;  %v2492_v25 = vld [vmem:[#allocation18] sm:$0xff] (%p755_p10) }
 0x1fe   : >> { %2688 = vtanh.f32 %v1325_v30 }
 0x1ff   : >> { %v1376_v36 = vmul.f32 %v2687_v26, %v1375_v29 }
 0x201   : >> { %v1312_v34 = vpop.f32.mrf.mxu2  ;;  %v1377_v40 = vadd.f32 %v2687_v26, %v1376_v36 }
 0x202   : >> { %v1313_v35 = vadd.f32 %v1312_v34, %v1299_v31  ;;  %v1326_v37 = vpop.f32.mrf.mxu3  ;;  %v2693_v34 = vld [vmem:[%s3799_s22] ss:$0 sm:$0xff] (%p755_p10) }
 0x203   : >> { %v1381_v46 = vsel %vm1380_vm7, %v2687_v26, %v1377_v40 }
 0x204   : >> { %v1327_v38 = vadd.f32 %v1326_v37, %v1313_v35  ;;  %v2689_v47 = vpop.eup %2688  ;;  %v1386_v53 = vsel %vm1383_vm9, %v1385_v49, %v1381_v46 }
 0x205   : >> { %v1390_v54 = vmul.f32 %v2689_v47, %v1371_v51 }
 0x206   : >> { %2690 = vtanh.f32 %v1327_v38 }
 0x20c   : >> { %v2691_v50 = vpop.eup %2690 }
 0x20d   : >> { %v1391_v55 = vmul.f32 %v2691_v50, %v1386_v53 }
 0x20f   : >> { %v1392_v56 = vpack.c.bf16 %v1391_v55, %v1390_v54 }
 0x211   : >> { %1486 = vmatmul.bf16.vlgmr.msra.gmra.mxu0 %v1392_v56  ;;  %1500 = vmatmul.bf16.vlgmr.msra.gmra.mxu1 %v1392_v56 }
 0x212   : > { %1600 = vmatpush.bf16.msra.mxu0 (%p755_p10), %v2491_v7  ;;  %1668 = vmatpush.bf16.msra.mxu1 (%p755_p10), %v2499_v9 }
 0x216   : > { %1601 = vmatpush.bf16.msra.mxu0 (%p755_p10), %v2490_v8  ;;  %1669 = vmatpush.bf16.msra.mxu1 (%p755_p10), %v2498_v10 }
 0x21a   : > { %1602 = vmatpush.bf16.msra.mxu0 (%p755_p10), %v2489_v11  ;;  %1670 = vmatpush.bf16.msra.mxu1 (%p755_p10), %v2497_v12 }
 0x21e   : > { %1603 = vmatpush.bf16.msra.mxu0 (%p755_p10), %v2488_v13  ;;  %1671 = vmatpush.bf16.msra.mxu1 (%p755_p10), %v2496_v15 }
 0x222   : > { %1604 = vmatpush.bf16.msra.mxu0 (%p755_p10), %v2487_v16  ;;  %1672 = vmatpush.bf16.msra.mxu1 (%p755_p10), %v2495_v22 }
 0x226   : > { %1673 = vmatpush.bf16.msra.mxu1 (%p755_p10), %v2494_v23 }
 0x22a   : > { %1674 = vmatpush.bf16.msra.mxu1 (%p755_p10), %v2493_v24 }
 0x22e   : > { %1675 = vmatpush.bf16.msra.mxu1 (%p755_p10), %v2492_v25 }
 0x28e   : >> { %v1487_v60 = vpop.f32.mrf.mxu0  ;;  %v1501_v62 = vpop.f32.mrf.mxu1 }
 0x28f   : >> { %v1488_v63 = vadd.f32 %v1487_v60, %v1394_v58  ;;  %v1502_v0 = vadd.f32 %v1501_v62, %v1395_v59 }
 0x291   : >> { %v1506_v61 = vadd.f32 %v3116_v14, %v1488_v63  ;;  %v1510_v1 = vadd.f32 %v3108_v19, %v1502_v0  }
 0x293   : >> { %v1508_v14 = vmul.f32 0.70710677, %v1506_v61   ;;  %v3797_v19 = vmov %v1510_v1 }
 0x294   : > { %v2486_v14 = vld [vmem:[#allocation17 + $0x10] sm:$0xff] (%p755_p10) }
 0x295   : > { %1605 = vmatpush.bf16.msra.mxu0 (%p755_p10), %v2486_v14 }
 0x296   : >> { %v1489_v2 = vpop.f32.mrf.mxu0  ;;  %v1503_v52 = vpop.f32.mrf.mxu1 }
 0x297   : >> { %v1490_v33 = vadd.f32 %v1489_v2, %v1394_v58  ;;  %v1504_v4 = vadd.f32 %v1503_v52, %v1395_v59  ;;  %757 = sbr.rel (!%p755_p10) target bundleno = 304 (0x130), region = 181 }
 0x299   : >> { %v1507_v5 = vadd.f32 %v3112_v17, %v1490_v33  ;;  %v1511_v6 = vadd.f32 %v3104_v18, %v1504_v4  }
 0x29b   : >> { %v1509_v17 = vmul.f32 0.70710677, %v1507_v5   ;;  %v3796_v18 = vmov %v1511_v6  ;;  %v1547_v19 = vmul.f32 (%p755_p10), 0.5, %v1511_v6 }
 0x29c   : > { %v2485_v17 = vld [vmem:[#allocation17 + $0x8] sm:$0xff]  ;;  %v1546_v18 = vmul.f32 0.5, %v1510_v1 }
 0x29d   : > { %1606 = vmatpush.bf16.msra.mxu0 %v2485_v17 }
 0x29e   : > { %v1548_v21 = vpack.c.bf16 %v1547_v19, %v1546_v18 }
 0x2a1   : > { %1607 = vmatpush.bf16.msra.mxu0 %v2484_v20 }
 0x2a4   : > { %1608 = vmatmul.bf16.vlgmr.msra.gmra.mxu0 %v1548_v21 }
 0x321   : > { %v1609_v26 = vpop.f32.mrf.mxu0 }
 0x322   : > { %v1610_v3 = vadd.f32 %v2692_v27, %v1609_v26 }
 0x324   : > { %v1614_v30 = vmax.f32 %v1610_v3, 0.0 }
 0x329   : > { %v1611_v28 = vpop.f32.mrf.mxu0 }
 0x32a   : > { %v1612_v29 = vadd.f32 %v2692_v27, %v1611_v28 }
 0x32c   : > { %v1615_v31 = vmax.f32 %v1612_v29, 0.0 }
 0x32e   : > { %v1616_v32 = vpack.c.bf16 %v1615_v31, %v1614_v30 }
 0x330   : > { %1676 = vmatmul.bf16.vlgmr.msra.gmra.mxu1 %v1616_v32 }
 0x3ad   : > { %v1677_v35 = vpop.f32.mrf.mxu1 }
 0x3ae   : > { %v1678_v36 = vadd.f32 %v2693_v34, %v1677_v35 }
 0x3b0   : > { %1682 = vst [vmem:[%s3440_s30] sm:$0xff] %v1678_v36 }
 0x3b5   : > { %v1679_v37 = vpop.f32.mrf.mxu1 }
 0x3b6   : > { %v1680_v38 = vadd.f32 %v2693_v34, %v1679_v37 }
 0x3b8   : > { %1683 = vst [vmem:[%s3440_s30 + $0x8] sm:$0xff] %v1680_v38 }
 0x3b9   : > { %3021 = shalt.err (!%p3018_p2)
}
 0x3ba   : > { %s3137_s12 = smov 128   ;;  %s3138_s30 = smov 8  }
 0x3bb   : > { %2535 = dma.vmem_to_hbm [thread:$0]  (%p3288_p0), %s1698_s24, 256, %s1700_s17, %s1685_s14, %s3137_s12, %s3137_s12, %s3138_s30  }
 0x3bc PF: > { %s3802_s13 = sld [smem:[#allocation28_spill]]  ;;  %p3804_p4 = scmp.ge.s32.totalorder %s3100_s28, 2 }
 0x3be   : > { %p2570_p13 = pnand %p3804_p4, %p3296_p5 }
 0x3c0   : > { %p2571_p1 = pneg %p2570_p13 }
 0x3c2   : > { %s1714_s20 = sand.u32 1, %s3802_s13  }
 0x3c3   : > { %s1715_s22 = scalar_lea.sflag [#allocation5], %s1714_s20 }
 0x3c4   : > { %3083 = dma.done.wait (%p2571_p1), %s1715_s22, 256  }
 0x3c5   : > { %3085 = vsyncadd (%p2571_p1), %s1715_s22, 4294967040  ;;  %s3805_s28 = sld [smem:[#allocation30_spill]]  ;;  %s3808_s25 = smov %s3092_s26 }
 0x3c6   : > { %s3806_s21 = sld [smem:[#allocation29_spill]] }
 0x3c7   : > { %s3807_s27 = sld [smem:[#allocation31_spill]] }
 0x3cb   : > { %p33_p7 = scmp.ge.s32.totalorder %s3805_s28, 4  }
 0x3cc   : > { %s3809_s26 = smov %s3806_s21 }
 0x3cd   :  { %35 = sbr.rel (!%p33_p7) target bundleno = 19 (0x13), region = 192 }
 0x3d2   :  { %1721 = vsyncpa [#allocation4], 1 }
 0x3d3   :  { %1723 = vsyncpa [#allocation4 + $0x1], 1 }
 0x3d4   :  { %1724 = vsyncpa [#allocation7], 1 }
 0x3d5   :  { %1726 = vsyncpa [#allocation7 + $0x1], 1 }
 0x3d6   :  { %1727 = vsyncpa [#allocation10], 1 }
 0x3d7   :  { %1728 = vsyncpa [#allocation13], 1 }
 0x3d8   :  { %1729 = vsyncpa [#allocation16], 1 }
 0x3d9   :  { %1730 = vsyncpa [#allocation19], 1 }
 0x3da   :  { %1731 = vsyncpa [#allocation5], 1 }
 0x3db   :  { %1733 = vsyncpa [#allocation5 + $0x1], 1 }

</bundles_post_ra>
